<compile_context>
chip_gen: v6e
topology: v6e:2x2x1
jax: 0.10.0
libtpu: 0.0.40
codegen_flags: <defaults>
</compile_context>

<pallas_src>
import jax
import jax.numpy as jnp
from jax.experimental import pallas as pl
from jax.experimental.pallas import tpu as pltpu

NBLOCK = 2
NL = [16, 64, 64, 64]       # nblock > 1.5 and nl[1] == nl[-1], so no append happens
OUTPUTNEURON = 1
LN_EPS = 1e-5               # PyTorch LayerNorm default eps

# Packed per-feature parameter columns, shape (H, NCOL):
#   col 0                         : b0 (input-linear bias)
#   cols 1 + (ib*2+j)*3 .. +2     : [act_alpha, 0.5*act_beta, folded linear bias]
#   col NCOL-2                    : 0.5 * act_bf   (final activation half-beta)
#   col NCOL-1                    : act_af * wf[:,0] (alpha folded into out weight)
PCOL_PER_SUB = 3
NCOL = 1 + NBLOCK * 2 * PCOL_PER_SUB + 2
COL_B0 = 0
COL_HBF = NCOL - 2
COL_WFA = NCOL - 1


def _col_base(ib, j):
    return 1 + (ib * 2 + j) * PCOL_PER_SUB


def _round_up(n, m):
    return ((n + m - 1) // m) * m


def _tanh(z, eup_bf16):
    # Single EUP transcendental. Optional bf16 EUP path for v6e/v7x only.
    if eup_bf16:
        return jnp.tanh(z.astype(jnp.bfloat16)).astype(jnp.float32)
    return jnp.tanh(z)


def _silu_like(x, alpha, halfbeta, eup_bf16):
    # alpha * silu(beta * x) with sigmoid(z) = 0.5*(tanh(0.5*z)+1):
    #   h2 = 0.5*beta*x ;  result = alpha * h2 * (tanh(h2) + 1)
    h2 = x * halfbeta
    g = _tanh(h2, eup_bf16)
    return alpha * (h2 * (g + 1.0))


def _layernorm_feat0(x):
    """LayerNorm (normalize-only; affine folded into the next Linear) over the
    feature axis (axis 0 in the transposed (H, tm) layout), one-pass stats."""
    mu = jnp.mean(x, axis=0, keepdims=True)
    ex2 = jnp.mean(x * x, axis=0, keepdims=True)
    var = jnp.maximum(ex2 - mu * mu, 0.0)
    return (x - mu) * jax.lax.rsqrt(var + LN_EPS)


def _make_kernel(eup_bf16):
    def mlp_kernel(x_ref, w0_ref, w_rb_ref, pvec_ref, bf_ref, out_ref):
        # x_ref   : (tm, D_in)        f32 input block (batch on sublanes here)
        # w0_ref  : (H, D_in)         f32
        # w_rb_ref: (NBLOCK*2, H, H)  f32 (LayerNorm gamma pre-folded)
        # pvec_ref: (H, NCOL)         f32 packed per-feature params
        # bf_ref  : (1,)              f32 final bias, SMEM scalar
        # out_ref : (1, tm)           f32 lane-dense output block
        x = x_ref[...]
        w0 = w0_ref[...]

        # Input linear: contract the 16-feature axis of both operands -> (H, tm),
        # i.e. h = W0 @ x^T with f32 accumulation; no wrapper-side transpose of x.
        h = jax.lax.dot_general(w0, x, (((1,), (1,)), ((), ())),
                                preferred_element_type=jnp.float32)
        h = h + pvec_ref[:, COL_B0:COL_B0 + 1]

        # Residual blocks (statically unrolled)
        for ib in range(NBLOCK):
            r = h
            t = r
            for j in range(2):              # two (act, LN, Linear) sub-layers
                c = _col_base(ib, j)
                alpha = pvec_ref[:, c + 0:c + 1]
                halfb = pvec_ref[:, c + 1:c + 2]
                bias = pvec_ref[:, c + 2:c + 3]
                t = _silu_like(t, alpha, halfb, eup_bf16)   # 1 tanh on the EUP
                t = _layernorm_feat0(t)                     # one-pass stats
                w = w_rb_ref[ib * 2 + j]                    # (H, H), gamma folded
                t = jnp.dot(w, t, preferred_element_type=jnp.float32) + bias
            h = t + r

        # Final activation + 64->1 projection.  act_af is folded into the weight
        # column, so:  out = sum_i wfa_i * h2_i * (tanh(h2_i)+1) + bf
        # VPU multiply + sublane reduction -> (1, tm) lane-dense store (no N=1 MXU).
        h2 = h * pvec_ref[:, COL_HBF:COL_HBF + 1]
        g = _tanh(h2, eup_bf16)
        wz = h2 * pvec_ref[:, COL_WFA:COL_WFA + 1]
        out_ref[...] = (jnp.sum(wz * (g + 1.0), axis=0, keepdims=True)
                        + bf_ref[0])
    return mlp_kernel


def pack_params(params):
    """One-time parameter packing/folding.  Call OUTSIDE the hot path and reuse
    the result in nnmod_forward_packed (per review: hoist packing/casting)."""
    (w0, b0, act_a, act_b, ln_g, ln_b, w_rb, b_rb,
     act_af, act_bf, wf, bf) = params
    H = NL[1]

    cols = [jnp.asarray(b0, jnp.float32)]
    w_list = []
    for ib in range(NBLOCK):
        for j in range(2):
            wt = jnp.transpose(w_rb[ib, j]).astype(jnp.float32)   # (H_out, H_in)
            g = ln_g[ib, j].astype(jnp.float32)
            lb = ln_b[ib, j].astype(jnp.float32)
            # Fold the LayerNorm affine into the following Linear:
            #   W @ (g*xn + lb) + b  ==  (W*g) @ xn + (b + W@lb)
            w_fold = wt * g[None, :]
            b_fold = b_rb[ib, j].astype(jnp.float32) + wt @ lb
            w_list.append(w_fold)
            cols += [act_a[ib, j].astype(jnp.float32),
                     0.5 * act_b[ib, j].astype(jnp.float32),
                     b_fold]
    cols += [0.5 * act_bf.astype(jnp.float32),
             (act_af * wf[:, 0]).astype(jnp.float32)]

    pvec = jnp.stack(cols, axis=1)                       # (H, NCOL)
    w0_t = jnp.transpose(w0).astype(jnp.float32)         # (H, D_in)
    w_rb_t = jnp.stack(w_list, axis=0)                   # (NBLOCK*2, H, H)
    bf_s = jnp.asarray(bf, jnp.float32).reshape(1)       # (1,) SMEM scalar
    return (w0_t, w_rb_t, pvec, bf_s)


def nnmod_forward_packed(x, packed, *, tm=None, eup_bf16=False):
    """NNMod forward with prepacked params.  x: (B, 16) f32 -> (B, 1) f32."""
    w0_t, w_rb_t, pvec, bf_s = packed
    B, D = x.shape
    assert D == NL[0]
    H = NL[1]

    # Tile selection: batch maps to lanes; tile must be a multiple of 128.
    b128 = _round_up(B, 128)
    if tm is None:
        if b128 <= 512:
            tm = b128                                  # grid=(1,) for small B
        else:
            # >=2 grid steps so the parallel axis can shard across v7x's 2 TCs;
            # cap at 4096 lanes (comfortably inside the default scoped VMEM).
            tm = min(4096, _round_up(-(-b128 // 2), 128))
    assert tm % 128 == 0
    B_pad = _round_up(B, tm)
    grid = (B_pad // tm,)

    x_p = x.astype(jnp.float32)
    if B_pad != B:
        x_p = jnp.pad(x_p, ((0, B_pad - B), (0, 0)))   # rows only; no transpose

    in_specs = [
        pl.BlockSpec((tm, NL[0]), lambda i: (i, 0)),           # x block
        pl.BlockSpec((H, NL[0]), lambda i: (0, 0)),            # W0^T (resident)
        pl.BlockSpec((NBLOCK * 2, H, H), lambda i: (0, 0, 0)),  # ResBlock weights
        pl.BlockSpec((H, NCOL), lambda i: (0, 0)),             # packed per-feat params
        pl.BlockSpec(memory_space=pltpu.MemorySpace.SMEM),     # final bias scalar
    ]
    out_spec = pl.BlockSpec((1, tm), lambda i: (0, i))          # lane-dense output

    flops = B_pad * (2 * NL[0] * H + NBLOCK * 2 * 2 * H * H + 2 * H)
    transcendentals = B_pad * (5 * H + NBLOCK * 2)              # tanh + rsqrt
    bytes_accessed = (B_pad * NL[0] * 4 + B_pad * 4 +
                      w0_t.size * 4 + w_rb_t.size * 4 + pvec.size * 4 + 4)

    out2d = pl.pallas_call(
        _make_kernel(eup_bf16),
        out_shape=jax.ShapeDtypeStruct((1, B_pad), jnp.float32),
        grid=grid,
        in_specs=in_specs,
        out_specs=out_spec,
        compiler_params=pltpu.CompilerParams(
            dimension_semantics=("parallel",)),
        cost_estimate=pl.CostEstimate(
            flops=int(flops),
            transcendentals=int(transcendentals),
            bytes_accessed=int(bytes_accessed)),
    )(x_p, w0_t, w_rb_t, pvec, bf_s)

    return out2d[0, :B].reshape(B, OUTPUTNEURON)


def nnmod_forward(x, params, **kw):
    """Convenience wrapper: pack params then run (prefer the packed path in loops)."""
    return nnmod_forward_packed(x, pack_params(params), **kw)


# ----------------------------- pure-JAX reference -----------------------------

def _silu_like_ref(x, alpha, beta):
    z = x * beta
    return alpha * (z * jax.nn.sigmoid(z))


def _layernorm_ref(x, gamma, beta):
    mu = jnp.mean(x, axis=-1, keepdims=True)
    var = jnp.mean((x - mu) ** 2, axis=-1, keepdims=True)
    return (x - mu) * jax.lax.rsqrt(var + LN_EPS) * gamma + beta


def nnmod_ref(x, params):
    (w0, b0, act_a, act_b, ln_g, ln_b, w_rb, b_rb,
     act_af, act_bf, wf, bf) = params
    h = x @ w0 + b0
    for ib in range(NBLOCK):
        r = h
        t = r
        for j in range(2):
            t = _silu_like_ref(t, act_a[ib, j], act_b[ib, j])
            t = _layernorm_ref(t, ln_g[ib, j], ln_b[ib, j])
            t = t @ w_rb[ib, j] + b_rb[ib, j]
        h = t + r
    h = _silu_like_ref(h, act_af, act_bf)
    return h @ wf + bf


def init_params(key):
    """Deterministic synthetic parameters (shapes follow the PyTorch __init__).

    Values use scaled normals instead of the literal zeros_() of the last
    ResBlock / output Linear so the kernel computation is non-degenerate.
    """
    h = NL[1]
    ks = jax.random.split(key, 16)
    w0 = jax.random.normal(ks[0], (NL[0], h), jnp.float32) / jnp.sqrt(NL[0])
    b0 = 0.01 * jax.random.normal(ks[1], (h,), jnp.float32)

    act_a = 1.0 + 0.05 * jax.random.normal(ks[2], (NBLOCK, 2, h), jnp.float32)
    act_b = 1.0 + 0.05 * jax.random.normal(ks[3], (NBLOCK, 2, h), jnp.float32)
    ln_g = 1.0 + 0.05 * jax.random.normal(ks[9], (NBLOCK, 2, h), jnp.float32)
    ln_b = 0.01 * jax.random.normal(ks[10], (NBLOCK, 2, h), jnp.float32)
    w_rb = jax.random.normal(ks[4], (NBLOCK, 2, h, h), jnp.float32) / jnp.sqrt(h)
    b_rb = 0.01 * jax.random.normal(ks[5], (NBLOCK, 2, h), jnp.float32)

    act_af = 1.0 + 0.05 * jax.random.normal(ks[6], (h,), jnp.float32)
    act_bf = 1.0 + 0.05 * jax.random.normal(ks[7], (h,), jnp.float32)
    wf = jax.random.normal(ks[8], (h, OUTPUTNEURON), jnp.float32) / jnp.sqrt(h)
    bf = jnp.zeros((OUTPUTNEURON,), jnp.float32)    # initbias = torch.zeros(1)

    return [w0, b0, act_a, act_b, ln_g, ln_b, w_rb, b_rb,
            act_af, act_bf, wf, bf]


if __name__ == "__main__":
    key = jax.random.PRNGKey(0)
    k_x, k_p = jax.random.split(key)

    B = 200                                   # ragged batch: exercises row padding
    x = jax.random.normal(k_x, (B, NL[0]), jnp.float32)
    params = init_params(k_p)

    ref = nnmod_ref(x, params)

    # Pack once (out of the hot path), then call the kernel.
    packed = jax.block_until_ready(pack_params(params))

    # Default tile heuristic: tm=256, grid=(1,).
    out = jax.block_until_ready(nnmod_forward_packed(x, packed))
    assert out.shape == (B, OUTPUTNEURON)
    assert jnp.allclose(out, ref, rtol=2e-4, atol=2e-4), (
        float(jnp.max(jnp.abs(out - ref))))

    # Forced small tile -> grid=(2,), exercises the multi-step "parallel" path.
    out2 = jax.block_until_ready(nnmod_forward_packed(x, packed, tm=128))
    assert out2.shape == (B, OUTPUTNEURON)
    assert jnp.allclose(out2, ref, rtol=2e-4, atol=2e-4), (
        float(jnp.max(jnp.abs(out2 - ref))))

    # TODO(synk): eup_bf16=True (bf16 tanh on the EUP) is a v6e/v7x-only option;
    # left disabled here pending accuracy validation for the target application.

    print("KERNEL_OK")
</pallas_src>

<mosaic_0001>
module attributes {stable_mosaic.version = 11 : i64} {
  func.func @mlp_kernel(%arg0: i32, %arg1: memref<256x16xf32, #tpu.memory_space<vmem>>, %arg2: memref<64x16xf32, #tpu.memory_space<vmem>>, %arg3: memref<4x64x64xf32, #tpu.memory_space<vmem>>, %arg4: memref<64x15xf32, #tpu.memory_space<vmem>>, %arg5: memref<1xf32, #tpu.memory_space<smem>>, %arg6: memref<1x256xf32, #tpu.memory_space<vmem>>) attributes {dimension_semantics = [#tpu.dimension_semantics<parallel>], iteration_bounds = array<i64: 1>, scalar_prefetch = 0 : i64, scratch_operands = 0 : i64, tpu.core_type = #tpu.core_type<tc>, window_params = [{transform_indices = @transform_0, window_bounds = array<i64: 256, 16>}, {pipeline_mode = #tpu.pipeline_mode<synchronous>, transform_indices = @transform_1, window_bounds = array<i64: 64, 16>}, {pipeline_mode = #tpu.pipeline_mode<synchronous>, transform_indices = @transform_2, window_bounds = array<i64: 4, 64, 64>}, {pipeline_mode = #tpu.pipeline_mode<synchronous>, transform_indices = @transform_3, window_bounds = array<i64: 64, 15>}, {transform_indices = @transform_4, window_bounds = array<i64: 1>}, {transform_indices = @transform_5, window_bounds = array<i64: 1, 256>}]} {
    %c0 = arith.constant 0 : index
    %c0_0 = arith.constant 0 : index
    %0 = vector.load %arg1[%c0, %c0_0] : memref<256x16xf32, #tpu.memory_space<vmem>>, vector<256x16xf32>
    %c0_1 = arith.constant 0 : index
    %c0_2 = arith.constant 0 : index
    %1 = vector.load %arg2[%c0_1, %c0_2] : memref<64x16xf32, #tpu.memory_space<vmem>>, vector<64x16xf32>
    %cst = arith.constant dense<0.000000e+00> : vector<64x256xf32>
    %2 = tpu.matmul %1, %0, %cst {dimension_numbers = #tpu.dot_dimension_numbers<[1], [1], [0], [0], [0, 0, 1, 0], [], []>} : vector<64x16xf32>, vector<256x16xf32>, vector<64x256xf32> -> vector<64x256xf32>
    %c0_3 = arith.constant 0 : index
    %c0_4 = arith.constant 0 : index
    %3 = vector.load %arg4[%c0_3, %c0_4] : memref<64x15xf32, #tpu.memory_space<vmem>>, vector<64x1xf32>
    %4 = vector.broadcast %3 : vector<64x1xf32> to vector<64x256xf32>
    %5 = arith.addf %2, %4 : vector<64x256xf32>
    %c0_5 = arith.constant 0 : index
    %c1 = arith.constant 1 : index
    %6 = vector.load %arg4[%c0_5, %c1] : memref<64x15xf32, #tpu.memory_space<vmem>>, vector<64x1xf32>
    %c0_6 = arith.constant 0 : index
    %c2 = arith.constant 2 : index
    %7 = vector.load %arg4[%c0_6, %c2] : memref<64x15xf32, #tpu.memory_space<vmem>>, vector<64x1xf32>
    %c0_7 = arith.constant 0 : index
    %c3 = arith.constant 3 : index
    %8 = vector.load %arg4[%c0_7, %c3] : memref<64x15xf32, #tpu.memory_space<vmem>>, vector<64x1xf32>
    %9 = vector.broadcast %7 : vector<64x1xf32> to vector<64x256xf32>
    %10 = arith.mulf %5, %9 : vector<64x256xf32>
    %11 = math.tanh %10 : vector<64x256xf32>
    %cst_8 = arith.constant 1.000000e+00 : f32
    %12 = vector.broadcast %cst_8 : f32 to vector<64x256xf32>
    %13 = arith.addf %11, %12 : vector<64x256xf32>
    %14 = arith.mulf %10, %13 : vector<64x256xf32>
    %15 = vector.broadcast %6 : vector<64x1xf32> to vector<64x256xf32>
    %16 = arith.mulf %15, %14 : vector<64x256xf32>
    %cst_9 = arith.constant dense<0.000000e+00> : vector<256xf32>
    %17 = vector.multi_reduction <add>, %16, %cst_9 [0] : vector<64x256xf32> to vector<256xf32>
    %18 = vector.shape_cast %17 : vector<256xf32> to vector<1x256xf32>
    %cst_10 = arith.constant 6.400000e+01 : f32
    %19 = vector.broadcast %cst_10 : f32 to vector<1x256xf32>
    %20 = arith.divf %18, %19 : vector<1x256xf32>
    %21 = arith.mulf %16, %16 : vector<64x256xf32>
    %cst_11 = arith.constant dense<0.000000e+00> : vector<256xf32>
    %22 = vector.multi_reduction <add>, %21, %cst_11 [0] : vector<64x256xf32> to vector<256xf32>
    %23 = vector.shape_cast %22 : vector<256xf32> to vector<1x256xf32>
    %cst_12 = arith.constant 6.400000e+01 : f32
    %24 = vector.broadcast %cst_12 : f32 to vector<1x256xf32>
    %25 = arith.divf %23, %24 : vector<1x256xf32>
    %26 = arith.mulf %20, %20 : vector<1x256xf32>
    %27 = arith.subf %25, %26 : vector<1x256xf32>
    %cst_13 = arith.constant 0.000000e+00 : f32
    %28 = vector.broadcast %cst_13 : f32 to vector<1x256xf32>
    %29 = arith.maximumf %27, %28 : vector<1x256xf32>
    %30 = vector.broadcast %20 : vector<1x256xf32> to vector<64x256xf32>
    %31 = arith.subf %16, %30 : vector<64x256xf32>
    %cst_14 = arith.constant 9.99999974E-6 : f32
    %32 = vector.broadcast %cst_14 : f32 to vector<1x256xf32>
    %33 = arith.addf %29, %32 : vector<1x256xf32>
    %34 = math.rsqrt %33 : vector<1x256xf32>
    %35 = vector.broadcast %34 : vector<1x256xf32> to vector<64x256xf32>
    %36 = arith.mulf %31, %35 : vector<64x256xf32>
    %c0_15 = arith.constant 0 : index
    %c0_16 = arith.constant 0 : index
    %c0_17 = arith.constant 0 : index
    %37 = vector.load %arg3[%c0_15, %c0_16, %c0_17] : memref<4x64x64xf32, #tpu.memory_space<vmem>>, vector<1x64x64xf32>
    %38 = vector.shape_cast %37 : vector<1x64x64xf32> to vector<64x64xf32>
    %cst_18 = arith.constant dense<0.000000e+00> : vector<64x256xf32>
    %39 = tpu.matmul %38, %36, %cst_18 {dimension_numbers = #tpu.dot_dimension_numbers<[1], [0], [0], [1], [0, 0, 1, 1], [], []>} : vector<64x64xf32>, vector<64x256xf32>, vector<64x256xf32> -> vector<64x256xf32>
    %40 = vector.broadcast %8 : vector<64x1xf32> to vector<64x256xf32>
    %41 = arith.addf %39, %40 : vector<64x256xf32>
    %c0_19 = arith.constant 0 : index
    %c4 = arith.constant 4 : index
    %42 = vector.load %arg4[%c0_19, %c4] : memref<64x15xf32, #tpu.memory_space<vmem>>, vector<64x1xf32>
    %c0_20 = arith.constant 0 : index
    %c5 = arith.constant 5 : index
    %43 = vector.load %arg4[%c0_20, %c5] : memref<64x15xf32, #tpu.memory_space<vmem>>, vector<64x1xf32>
    %c0_21 = arith.constant 0 : index
    %c6 = arith.constant 6 : index
    %44 = vector.load %arg4[%c0_21, %c6] : memref<64x15xf32, #tpu.memory_space<vmem>>, vector<64x1xf32>
    %45 = vector.broadcast %43 : vector<64x1xf32> to vector<64x256xf32>
    %46 = arith.mulf %41, %45 : vector<64x256xf32>
    %47 = math.tanh %46 : vector<64x256xf32>
    %cst_22 = arith.constant 1.000000e+00 : f32
    %48 = vector.broadcast %cst_22 : f32 to vector<64x256xf32>
    %49 = arith.addf %47, %48 : vector<64x256xf32>
    %50 = arith.mulf %46, %49 : vector<64x256xf32>
    %51 = vector.broadcast %42 : vector<64x1xf32> to vector<64x256xf32>
    %52 = arith.mulf %51, %50 : vector<64x256xf32>
    %cst_23 = arith.constant dense<0.000000e+00> : vector<256xf32>
    %53 = vector.multi_reduction <add>, %52, %cst_23 [0] : vector<64x256xf32> to vector<256xf32>
    %54 = vector.shape_cast %53 : vector<256xf32> to vector<1x256xf32>
    %cst_24 = arith.constant 6.400000e+01 : f32
    %55 = vector.broadcast %cst_24 : f32 to vector<1x256xf32>
    %56 = arith.divf %54, %55 : vector<1x256xf32>
    %57 = arith.mulf %52, %52 : vector<64x256xf32>
    %cst_25 = arith.constant dense<0.000000e+00> : vector<256xf32>
    %58 = vector.multi_reduction <add>, %57, %cst_25 [0] : vector<64x256xf32> to vector<256xf32>
    %59 = vector.shape_cast %58 : vector<256xf32> to vector<1x256xf32>
    %cst_26 = arith.constant 6.400000e+01 : f32
    %60 = vector.broadcast %cst_26 : f32 to vector<1x256xf32>
    %61 = arith.divf %59, %60 : vector<1x256xf32>
    %62 = arith.mulf %56, %56 : vector<1x256xf32>
    %63 = arith.subf %61, %62 : vector<1x256xf32>
    %cst_27 = arith.constant 0.000000e+00 : f32
    %64 = vector.broadcast %cst_27 : f32 to vector<1x256xf32>
    %65 = arith.maximumf %63, %64 : vector<1x256xf32>
    %66 = vector.broadcast %56 : vector<1x256xf32> to vector<64x256xf32>
    %67 = arith.subf %52, %66 : vector<64x256xf32>
    %cst_28 = arith.constant 9.99999974E-6 : f32
    %68 = vector.broadcast %cst_28 : f32 to vector<1x256xf32>
    %69 = arith.addf %65, %68 : vector<1x256xf32>
    %70 = math.rsqrt %69 : vector<1x256xf32>
    %71 = vector.broadcast %70 : vector<1x256xf32> to vector<64x256xf32>
    %72 = arith.mulf %67, %71 : vector<64x256xf32>
    %c1_29 = arith.constant 1 : index
    %c0_30 = arith.constant 0 : index
    %c0_31 = arith.constant 0 : index
    %73 = vector.load %arg3[%c1_29, %c0_30, %c0_31] : memref<4x64x64xf32, #tpu.memory_space<vmem>>, vector<1x64x64xf32>
    %74 = vector.shape_cast %73 : vector<1x64x64xf32> to vector<64x64xf32>
    %cst_32 = arith.constant dense<0.000000e+00> : vector<64x256xf32>
    %75 = tpu.matmul %74, %72, %cst_32 {dimension_numbers = #tpu.dot_dimension_numbers<[1], [0], [0], [1], [0, 0, 1, 1], [], []>} : vector<64x64xf32>, vector<64x256xf32>, vector<64x256xf32> -> vector<64x256xf32>
    %76 = vector.broadcast %44 : vector<64x1xf32> to vector<64x256xf32>
    %77 = arith.addf %75, %76 : vector<64x256xf32>
    %78 = arith.addf %77, %5 : vector<64x256xf32>
    %c0_33 = arith.constant 0 : index
    %c7 = arith.constant 7 : index
    %79 = vector.load %arg4[%c0_33, %c7] : memref<64x15xf32, #tpu.memory_space<vmem>>, vector<64x1xf32>
    %c0_34 = arith.constant 0 : index
    %c8 = arith.constant 8 : index
    %80 = vector.load %arg4[%c0_34, %c8] : memref<64x15xf32, #tpu.memory_space<vmem>>, vector<64x1xf32>
    %c0_35 = arith.constant 0 : index
    %c9 = arith.constant 9 : index
    %81 = vector.load %arg4[%c0_35, %c9] : memref<64x15xf32, #tpu.memory_space<vmem>>, vector<64x1xf32>
    %82 = vector.broadcast %80 : vector<64x1xf32> to vector<64x256xf32>
    %83 = arith.mulf %78, %82 : vector<64x256xf32>
    %84 = math.tanh %83 : vector<64x256xf32>
    %cst_36 = arith.constant 1.000000e+00 : f32
    %85 = vector.broadcast %cst_36 : f32 to vector<64x256xf32>
    %86 = arith.addf %84, %85 : vector<64x256xf32>
    %87 = arith.mulf %83, %86 : vector<64x256xf32>
    %88 = vector.broadcast %79 : vector<64x1xf32> to vector<64x256xf32>
    %89 = arith.mulf %88, %87 : vector<64x256xf32>
    %cst_37 = arith.constant dense<0.000000e+00> : vector<256xf32>
    %90 = vector.multi_reduction <add>, %89, %cst_37 [0] : vector<64x256xf32> to vector<256xf32>
    %91 = vector.shape_cast %90 : vector<256xf32> to vector<1x256xf32>
    %cst_38 = arith.constant 6.400000e+01 : f32
    %92 = vector.broadcast %cst_38 : f32 to vector<1x256xf32>
    %93 = arith.divf %91, %92 : vector<1x256xf32>
    %94 = arith.mulf %89, %89 : vector<64x256xf32>
    %cst_39 = arith.constant dense<0.000000e+00> : vector<256xf32>
    %95 = vector.multi_reduction <add>, %94, %cst_39 [0] : vector<64x256xf32> to vector<256xf32>
    %96 = vector.shape_cast %95 : vector<256xf32> to vector<1x256xf32>
    %cst_40 = arith.constant 6.400000e+01 : f32
    %97 = vector.broadcast %cst_40 : f32 to vector<1x256xf32>
    %98 = arith.divf %96, %97 : vector<1x256xf32>
    %99 = arith.mulf %93, %93 : vector<1x256xf32>
    %100 = arith.subf %98, %99 : vector<1x256xf32>
    %cst_41 = arith.constant 0.000000e+00 : f32
    %101 = vector.broadcast %cst_41 : f32 to vector<1x256xf32>
    %102 = arith.maximumf %100, %101 : vector<1x256xf32>
    %103 = vector.broadcast %93 : vector<1x256xf32> to vector<64x256xf32>
    %104 = arith.subf %89, %103 : vector<64x256xf32>
    %cst_42 = arith.constant 9.99999974E-6 : f32
    %105 = vector.broadcast %cst_42 : f32 to vector<1x256xf32>
    %106 = arith.addf %102, %105 : vector<1x256xf32>
    %107 = math.rsqrt %106 : vector<1x256xf32>
    %108 = vector.broadcast %107 : vector<1x256xf32> to vector<64x256xf32>
    %109 = arith.mulf %104, %108 : vector<64x256xf32>
    %c2_43 = arith.constant 2 : index
    %c0_44 = arith.constant 0 : index
    %c0_45 = arith.constant 0 : index
    %110 = vector.load %arg3[%c2_43, %c0_44, %c0_45] : memref<4x64x64xf32, #tpu.memory_space<vmem>>, vector<1x64x64xf32>
    %111 = vector.shape_cast %110 : vector<1x64x64xf32> to vector<64x64xf32>
    %cst_46 = arith.constant dense<0.000000e+00> : vector<64x256xf32>
    %112 = tpu.matmul %111, %109, %cst_46 {dimension_numbers = #tpu.dot_dimension_numbers<[1], [0], [0], [1], [0, 0, 1, 1], [], []>} : vector<64x64xf32>, vector<64x256xf32>, vector<64x256xf32> -> vector<64x256xf32>
    %113 = vector.broadcast %81 : vector<64x1xf32> to vector<64x256xf32>
    %114 = arith.addf %112, %113 : vector<64x256xf32>
    %c0_47 = arith.constant 0 : index
    %c10 = arith.constant 10 : index
    %115 = vector.load %arg4[%c0_47, %c10] : memref<64x15xf32, #tpu.memory_space<vmem>>, vector<64x1xf32>
    %c0_48 = arith.constant 0 : index
    %c11 = arith.constant 11 : index
    %116 = vector.load %arg4[%c0_48, %c11] : memref<64x15xf32, #tpu.memory_space<vmem>>, vector<64x1xf32>
    %c0_49 = arith.constant 0 : index
    %c12 = arith.constant 12 : index
    %117 = vector.load %arg4[%c0_49, %c12] : memref<64x15xf32, #tpu.memory_space<vmem>>, vector<64x1xf32>
    %118 = vector.broadcast %116 : vector<64x1xf32> to vector<64x256xf32>
    %119 = arith.mulf %114, %118 : vector<64x256xf32>
    %120 = math.tanh %119 : vector<64x256xf32>
    %cst_50 = arith.constant 1.000000e+00 : f32
    %121 = vector.broadcast %cst_50 : f32 to vector<64x256xf32>
    %122 = arith.addf %120, %121 : vector<64x256xf32>
    %123 = arith.mulf %119, %122 : vector<64x256xf32>
    %124 = vector.broadcast %115 : vector<64x1xf32> to vector<64x256xf32>
    %125 = arith.mulf %124, %123 : vector<64x256xf32>
    %cst_51 = arith.constant dense<0.000000e+00> : vector<256xf32>
    %126 = vector.multi_reduction <add>, %125, %cst_51 [0] : vector<64x256xf32> to vector<256xf32>
    %127 = vector.shape_cast %126 : vector<256xf32> to vector<1x256xf32>
    %cst_52 = arith.constant 6.400000e+01 : f32
    %128 = vector.broadcast %cst_52 : f32 to vector<1x256xf32>
    %129 = arith.divf %127, %128 : vector<1x256xf32>
    %130 = arith.mulf %125, %125 : vector<64x256xf32>
    %cst_53 = arith.constant dense<0.000000e+00> : vector<256xf32>
    %131 = vector.multi_reduction <add>, %130, %cst_53 [0] : vector<64x256xf32> to vector<256xf32>
    %132 = vector.shape_cast %131 : vector<256xf32> to vector<1x256xf32>
    %cst_54 = arith.constant 6.400000e+01 : f32
    %133 = vector.broadcast %cst_54 : f32 to vector<1x256xf32>
    %134 = arith.divf %132, %133 : vector<1x256xf32>
    %135 = arith.mulf %129, %129 : vector<1x256xf32>
    %136 = arith.subf %134, %135 : vector<1x256xf32>
    %cst_55 = arith.constant 0.000000e+00 : f32
    %137 = vector.broadcast %cst_55 : f32 to vector<1x256xf32>
    %138 = arith.maximumf %136, %137 : vector<1x256xf32>
    %139 = vector.broadcast %129 : vector<1x256xf32> to vector<64x256xf32>
    %140 = arith.subf %125, %139 : vector<64x256xf32>
    %cst_56 = arith.constant 9.99999974E-6 : f32
    %141 = vector.broadcast %cst_56 : f32 to vector<1x256xf32>
    %142 = arith.addf %138, %141 : vector<1x256xf32>
    %143 = math.rsqrt %142 : vector<1x256xf32>
    %144 = vector.broadcast %143 : vector<1x256xf32> to vector<64x256xf32>
    %145 = arith.mulf %140, %144 : vector<64x256xf32>
    %c3_57 = arith.constant 3 : index
    %c0_58 = arith.constant 0 : index
    %c0_59 = arith.constant 0 : index
    %146 = vector.load %arg3[%c3_57, %c0_58, %c0_59] : memref<4x64x64xf32, #tpu.memory_space<vmem>>, vector<1x64x64xf32>
    %147 = vector.shape_cast %146 : vector<1x64x64xf32> to vector<64x64xf32>
    %cst_60 = arith.constant dense<0.000000e+00> : vector<64x256xf32>
    %148 = tpu.matmul %147, %145, %cst_60 {dimension_numbers = #tpu.dot_dimension_numbers<[1], [0], [0], [1], [0, 0, 1, 1], [], []>} : vector<64x64xf32>, vector<64x256xf32>, vector<64x256xf32> -> vector<64x256xf32>
    %149 = vector.broadcast %117 : vector<64x1xf32> to vector<64x256xf32>
    %150 = arith.addf %148, %149 : vector<64x256xf32>
    %151 = arith.addf %150, %78 : vector<64x256xf32>
    %c0_61 = arith.constant 0 : index
    %c13 = arith.constant 13 : index
    %152 = vector.load %arg4[%c0_61, %c13] : memref<64x15xf32, #tpu.memory_space<vmem>>, vector<64x1xf32>
    %153 = vector.broadcast %152 : vector<64x1xf32> to vector<64x256xf32>
    %154 = arith.mulf %151, %153 : vector<64x256xf32>
    %155 = math.tanh %154 : vector<64x256xf32>
    %c0_62 = arith.constant 0 : index
    %c14 = arith.constant 14 : index
    %156 = vector.load %arg4[%c0_62, %c14] : memref<64x15xf32, #tpu.memory_space<vmem>>, vector<64x1xf32>
    %157 = vector.broadcast %156 : vector<64x1xf32> to vector<64x256xf32>
    %158 = arith.mulf %154, %157 : vector<64x256xf32>
    %cst_63 = arith.constant 1.000000e+00 : f32
    %159 = vector.broadcast %cst_63 : f32 to vector<64x256xf32>
    %160 = arith.addf %155, %159 : vector<64x256xf32>
    %161 = arith.mulf %158, %160 : vector<64x256xf32>
    %cst_64 = arith.constant dense<0.000000e+00> : vector<256xf32>
    %162 = vector.multi_reduction <add>, %161, %cst_64 [0] : vector<64x256xf32> to vector<256xf32>
    %163 = vector.shape_cast %162 : vector<256xf32> to vector<1x256xf32>
    %c0_65 = arith.constant 0 : index
    %164 = memref.load %arg5[%c0_65] : memref<1xf32, #tpu.memory_space<smem>>
    %165 = vector.broadcast %164 : f32 to vector<1x256xf32>
    %166 = arith.addf %163, %165 : vector<1x256xf32>
    %c0_66 = arith.constant 0 : index
    %c0_67 = arith.constant 0 : index
    %167 = vector.load %arg6[%c0_66, %c0_67] : memref<1x256xf32, #tpu.memory_space<vmem>>, vector<1x256xf32>
    tpu.vector_store %arg6[%c0_66, %c0_67], %166 {strides = array<i32>} : memref<1x256xf32, #tpu.memory_space<vmem>>, vector<1x256xf32>,
    return
  }
  func.func @transform_0(%arg0: i32) -> (i32, i32) {
    %c0_i32 = arith.constant 0 : i32
    %c0_i32_0 = arith.constant 0 : i32
    return %arg0, %c0_i32 : i32, i32
  }
  func.func @transform_1(%arg0: i32) -> (i32, i32) {
    %c0_i32 = arith.constant 0 : i32
    %c0_i32_0 = arith.constant 0 : i32
    %c0_i32_1 = arith.constant 0 : i32
    return %c0_i32, %c0_i32_0 : i32, i32
  }
  func.func @transform_2(%arg0: i32) -> (i32, i32, i32) {
    %c0_i32 = arith.constant 0 : i32
    %c0_i32_0 = arith.constant 0 : i32
    %c0_i32_1 = arith.constant 0 : i32
    %c0_i32_2 = arith.constant 0 : i32
    return %c0_i32, %c0_i32_0, %c0_i32_1 : i32, i32, i32
  }
  func.func @transform_3(%arg0: i32) -> (i32, i32) {
    %c0_i32 = arith.constant 0 : i32
    %c0_i32_0 = arith.constant 0 : i32
    %c0_i32_1 = arith.constant 0 : i32
    return %c0_i32, %c0_i32_0 : i32, i32
  }
  func.func @transform_4(%arg0: i32) -> i32 {
    %c0_i32 = arith.constant 0 : i32
    %c0_i32_0 = arith.constant 0 : i32
    return %c0_i32 : i32
  }
  func.func @transform_5(%arg0: i32) -> (i32, i32) {
    %c0_i32 = arith.constant 0 : i32
    %c0_i32_0 = arith.constant 0 : i32
    return %c0_i32, %arg0 : i32, i32
  }
}

</mosaic_0001>

<bundles_post_ra>
// kernel: tpu_custom_call.1
= control target key start
LH: loop header
LB: loop body
LE: loop exit
PB: predicated region body
PF: predicated region fallthrough
CT: control target
= control target key end

     0   :  { %vm110_vm0 = vcmask 130048   ;;  %v2770_v3 = vmov 0   ;;  %s4313_s0 = inlined_call_operand.vmem [shape: f32[256,16], index: 0, kind: input, shape index: {}]   ;;  %s4314_s1 = inlined_call_operand.vmem [shape: f32[64,16], index: 1, kind: input, shape index: {}]   ;;  %s4315_s2 = inlined_call_operand.vmem [shape: f32[4,64,64], index: 2, kind: input, shape index: {}]   ;;  %s4316_s3 = inlined_call_operand.vmem [shape: f32[64,15], index: 3, kind: input, shape index: {}]   ;;  %s4317_s4 = inlined_call_operand.<no memory space> [shape: f32[1], index: 4, kind: input, shape index: {}]   ;;  %s4318_s5 = inlined_call_operand.hbm [shape: f32[1,256], index: 5, kind: output, shape index: {}]  }
   0x1   :  { %v53_v0 = vld [vmem:[%s4313_s0 + $0xf8] sm:$0xff]  ;;  %v52_v2 = vld [vmem:[%s4313_s0 + $0xf0] sm:$0xff]  ;;  %2511 = vset.pattern.permute.xlu1 %v2770_v3  ;;  %2510 = vset.pattern.permute.xlu0 %v2770_v3  ;;  %v51_v5 = vld [vmem:[%s4313_s0 + $0xe8] sm:$0xff] }
   0x2   :  { %v37_v1 = vld [vmem:[%s4313_s0 + $0x78] sm:$0xff]  ;;  %2428 = vmatprep.subr.msk.mxu0 %vm110_vm0, %v53_v0  ;;  %v36_v4 = vld [vmem:[%s4313_s0 + $0x70] sm:$0xff]  ;;  %v35_v6 = vld [vmem:[%s4313_s0 + $0x68] sm:$0xff] }
   0x3   :  { %2429 = vmatpush3.xpose.msk.msra.mxu0 %vm110_vm0, %v37_v1  ;;  %v50_v7 = vld [vmem:[%s4313_s0 + $0xe0] sm:$0xff]  ;;  %v49_v10 = vld [vmem:[%s4313_s0 + $0xd8] sm:$0xff]  ;;  %v2864_v11 = vld [vmem:[%s4316_s3 + $0x10] sm:$0xff] }
   0x4   :  { %2430 = vmatprep.subr.msk.mxu0 %vm110_vm0, %v52_v2  ;;  %v2850_v8 = vld [vmem:[%s4314_s1] sm:$0xff]  ;;  %82 = vperm.xlu1 %2511, %v2864_v11   ;;  %v33_v13 = vld [vmem:[%s4313_s0 + $0x58] sm:$0xff]  ;;  %v48_v14 = vld [vmem:[%s4313_s0 + $0xd0] sm:$0xff] }
   0x5   :  { %v34_v9 = vld [vmem:[%s4313_s0 + $0x60] sm:$0xff]  ;;  %2460 = vmatprep.mubr.msk.f32.mxu0 %vm110_vm0, %v2850_v8 }
   0x6   :  { %v2871_v12 = vld [vmem:[%s4316_s3] sm:$0xff] }
   0x7   :  { %2431 = vmatpush3.xpose.msk.msra.mxu0 %vm110_vm0, %v36_v4  ;;  %72 = vperm.xlu0 %2510, %v2871_v12  }
   0x8   :  { %2432 = vmatprep.subr.msk.mxu0 %vm110_vm0, %v51_v5 }
   0xb   :  { %2433 = vmatpush3.xpose.msk.msra.mxu0 %vm110_vm0, %v35_v6 }
   0xc   :  { %2434 = vmatprep.subr.msk.mxu0 %vm110_vm0, %v50_v7 }
   0xf   :  { %2435 = vmatpush3.xpose.msk.msra.mxu0 %vm110_vm0, %v34_v9 }
  0x10   :  { %2436 = vmatprep.subr.msk.mxu0 %vm110_vm0, %v49_v10 }
  0x11   :  { %11 = vsyncpa [#allocation4], 0  ;;  %v2884_v15 = vld [vmem:[%s4316_s3 + $0x8] sm:$0xff]  ;;  %v2771_v16 = vmov 2   ;;  %v32_v17 = vld [vmem:[%s4313_s0 + $0x50] sm:$0xff]  ;;  %v2772_v35 = vmov 1  }
  0x12   :  { %2512 = vset.pattern.permute.xlu1 %v2771_v16  ;;  %v47_v18 = vld [vmem:[%s4313_s0 + $0xc8] sm:$0xff]  ;;  %77 = vperm.xlu0 %2510, %v2884_v15   ;;  %v2899_v19 = vld [vmem:[%s4316_s3 + $0x18] sm:$0xff]  ;;  %v2904_v20 = vld [vmem:[%s4316_s3 + $0x20] sm:$0xff]  ;;  %v4319_v55 = vmov 0.0   ;;  %vm643_vm1 = vcmask 523264   ;;  %s2787_s27 = smov [#allocation3]  }
  0x13   :  { %2437 = vmatpush3.xpose.msk.msra.mxu0 %vm110_vm0, %v33_v13  ;;  %345 = vperm.xlu1 %2512, %v2871_v12   ;;  %v31_v21 = vld [vmem:[%s4313_s0 + $0x48] sm:$0xff]  ;;  %v46_v22 = vld [vmem:[%s4313_s0 + $0xc0] sm:$0xff]  ;;  %v45_v24 = vld [vmem:[%s4313_s0 + $0xb8] sm:$0xff]  ;;  %s2324_s28 = sshll.u32 %s2787_s27, 4  ;;  %s2325_s28 = int_to_ptr.vmem [resolvable:$true] %s2324_s28 }
  0x14   :  { %2438 = vmatprep.subr.msk.mxu0 %vm110_vm0, %v48_v14  ;;  %v30_v23 = vld [vmem:[%s4313_s0 + $0x40] sm:$0xff]  ;;  %v29_v25 = vld [vmem:[%s4313_s0 + $0x38] sm:$0xff]  ;;  %v44_v26 = vld [vmem:[%s4313_s0 + $0xb0] sm:$0xff]  ;;  %732 = vmatprep.mubr.f32.mxu1 %v4319_v55  ;;  %p2753_p1 = scmp.lt.s32.totalorder %s2325_s28, %s2325_s28 }
  0x15   :  { %v28_v27 = vld [vmem:[%s4313_s0 + $0x30] sm:$0xff]  ;;  %v2945_v28 = vld [vmem:[%s4316_s3 + $0x28] sm:$0xff]  ;;  %v2953_v30 = vld [vmem:[%s4316_s3 + $0x38] sm:$0xff] }
  0x16   :  { %92 = vperm.xlu0 %2510, %v2904_v20   ;;  %v43_v29 = vld [vmem:[%s4313_s0 + $0xa8] sm:$0xff]  ;;  %v2966_v32 = vld [vmem:[%s4316_s3 + $0x30] sm:$0xff]  ;;  %v42_v33 = vld [vmem:[%s4313_s0 + $0xa0] sm:$0xff] }
  0x17   :  { %2439 = vmatpush3.xpose.msk.msra.mxu0 %vm110_vm0, %v32_v17  ;;  %2513 = vset.pattern.permute.xlu1 %v2770_v3  ;;  %v27_v31 = vld [vmem:[%s4313_s0 + $0x28] sm:$0xff]  ;;  %v26_v34 = vld [vmem:[%s4313_s0 + $0x20] sm:$0xff]  ;;  %v41_v36 = vld [vmem:[%s4313_s0 + $0x98] sm:$0xff] }
  0x18   :  { %2440 = vmatprep.subr.msk.mxu0 %vm110_vm0, %v47_v18  ;;  %87 = vperm.xlu1 %2513, %v2899_v19   ;;  %v25_v37 = vld [vmem:[%s4313_s0 + $0x18] sm:$0xff]  ;;  %v40_v38 = vld [vmem:[%s4313_s0 + $0x90] sm:$0xff]  ;;  %v39_v40 = vld [vmem:[%s4313_s0 + $0x88] sm:$0xff] }
  0x19   :  { %v24_v39 = vld [vmem:[%s4313_s0 + $0x10] sm:$0xff]  ;;  %v23_v41 = vld [vmem:[%s4313_s0 + $0x8] sm:$0xff]  ;;  %v38_v42 = vld [vmem:[%s4313_s0 + $0x80] sm:$0xff] }
  0x1a   :  { %2515 = vset.pattern.permute.xlu0 %v2771_v16  ;;  %v22_v43 = vld [vmem:[%s4313_s0] sm:$0xff]  ;;  %v55_v44 = vld [vmem:[%s4314_s1 + $0x8] sm:$0xff]  ;;  %v56_v45 = vld [vmem:[%s4314_s1 + $0x10] sm:$0xff]  ;;  %s2748_s0 = scalar_lea.vmem %s2325_s28, 32 }
  0x1b   :  { %2441 = vmatpush3.xpose.msk.msra.mxu0 %vm110_vm0, %v31_v21  ;;  %349 = vperm.xlu0 %2515, %v2884_v15   ;;  %v57_v46 = vld [vmem:[%s4314_s1 + $0x18] sm:$0xff]  ;;  %v58_v47 = vld [vmem:[%s4314_s1 + $0x20] sm:$0xff]  ;;  %v59_v48 = vld [vmem:[%s4314_s1 + $0x28] sm:$0xff]  ;;  %p2749_p0 = scmp.ne.s32.totalorder %s2325_s28, %s2748_s0  ;;  %p2754_p2 = scmp.lt.s32.totalorder %s2748_s0, %s2748_s0 }
  0x1c   :  { %2442 = vmatprep.subr.msk.mxu0 %vm110_vm0, %v46_v22  ;;  %2514 = vset.pattern.permute.xlu1 %v2771_v16  ;;  %v60_v49 = vld [vmem:[%s4314_s1 + $0x30] sm:$0xff]  ;;  %v61_v50 = vld [vmem:[%s4314_s1 + $0x38] sm:$0xff] }
  0x1d   :  { %353 = vperm.xlu1 %2514, %v2864_v11   ;;  %p2755_p3 = por %p2754_p2, %p2753_p1 }
  0x1f   :  { %2443 = vmatpush3.xpose.msk.msra.mxu0 %vm110_vm0, %v30_v23  ;;  %361 = vperm.xlu0 %2515, %v2904_v20   ;;  %p2756_p4 = pnand %p2755_p3, %p2749_p0 }
  0x20   :  { %2444 = vmatprep.subr.msk.mxu0 %vm110_vm0, %v45_v24 }
  0x21   :  { %357 = vperm.xlu1 %2514, %v2899_v19  }
  0x23   :  { %2445 = vmatpush3.xpose.msk.msra.mxu0 %vm110_vm0, %v29_v25  ;;  %2518 = vset.pattern.permute.xlu0 %v2770_v3 }
  0x24   :  { %2446 = vmatprep.subr.msk.mxu0 %vm110_vm0, %v44_v26  ;;  %107 = vperm.xlu0 %2518, %v2953_v30   ;;  %v2774_v26 = vmov 3  }
  0x25   :  { %2516 = vset.pattern.permute.xlu1 %v2770_v3 }
  0x26   :  { %97 = vperm.xlu1 %2516, %v2945_v28  }
  0x27   :  { %2447 = vmatpush3.xpose.msk.msra.mxu0 %vm110_vm0, %v28_v27 }
  0x28   :  { %2448 = vmatprep.subr.msk.mxu0 %vm110_vm0, %v43_v29  ;;  %2519 = vset.pattern.permute.xlu0 %v2772_v35 }
  0x29   :  { %441 = vperm.xlu0 %2519, %v2871_v12  }
  0x2a   :  { %102 = vperm.xlu1 %2516, %v2966_v32  }
  0x2b   :  { %2449 = vmatpush3.xpose.msk.msra.mxu0 %vm110_vm0, %v27_v31 }
  0x2c   :  { %2450 = vmatprep.subr.msk.mxu0 %vm110_vm0, %v42_v33 }
  0x2d   :  { %453 = vperm.xlu0 %2519, %v2899_v19  }
  0x2e   :  { %2517 = vset.pattern.permute.xlu1 %v2771_v16 }
  0x2f   :  { %2451 = vmatpush3.xpose.msk.msra.mxu0 %vm110_vm0, %v26_v34  ;;  %365 = vperm.xlu1 %2517, %v2945_v28  }
  0x30   :  { %2452 = vmatprep.subr.msk.mxu0 %vm110_vm0, %v41_v36 }
  0x31   :  { %461 = vperm.xlu0 %2519, %v2945_v28  }
  0x33   :  { %2453 = vmatpush3.xpose.msk.msra.mxu0 %vm110_vm0, %v25_v37  ;;  %369 = vperm.xlu1 %2517, %v2966_v32  }
  0x34   :  { %2454 = vmatprep.subr.msk.mxu0 %vm110_vm0, %v40_v38 }
  0x35   :  { %469 = vperm.xlu0 %2519, %v2953_v30  }
  0x37   :  { %2455 = vmatpush3.xpose.msk.msra.mxu0 %vm110_vm0, %v24_v39  ;;  %373 = vperm.xlu1 %2517, %v2953_v30  }
  0x38   :  { %2456 = vmatprep.subr.msk.mxu0 %vm110_vm0, %v39_v40 }
  0x39   :  { %2522 = vset.pattern.permute.xlu0 %v2774_v26 }
  0x3a   :  { %616 = vperm.xlu0 %2522, %v2884_v15  }
  0x3b   :  { %2457 = vmatpush3.xpose.msk.msra.mxu0 %vm110_vm0, %v23_v41  ;;  %2520 = vset.pattern.permute.xlu1 %v2772_v35 }
  0x3c   :  { %2458 = vmatprep.subr.msk.mxu0 %vm110_vm0, %v38_v42  ;;  %445 = vperm.xlu1 %2520, %v2884_v15  }
  0x3e   :  { %628 = vperm.xlu0 %2522, %v2904_v20  }
  0x3f   :  { %2459 = vmatpush3.xpose.msk.msra.mxu0 %vm110_vm0, %v22_v43 }
  0x40   :  { %449 = vperm.xlu1 %2520, %v2864_v11  }
  0x42   :  { %2461 = vmatmul.mubr.msk.f32.vlgmr.msra.gmra.mxu0 %vm110_vm0, %v2850_v8 }
  0x43   :  { %2462 = vmatprep.mubr.msk.f32.mxu0 %vm110_vm0, %v55_v44 }
  0x44   :  { %457 = vperm.xlu1 %2520, %v2904_v20  }
  0x46   :  { %2463 = vmatmul.mubr.msk.f32.gmra.mxu0 %vm110_vm0, %v55_v44 }
  0x47   :  { %2464 = vmatprep.mubr.msk.f32.mxu0 %vm110_vm0, %v56_v45 }
  0x48   :  { %465 = vperm.xlu1 %2520, %v2966_v32  }
  0x4a   :  { %2465 = vmatmul.mubr.msk.f32.gmra.mxu0 %vm110_vm0, %v56_v45 }
  0x4b   :  { %2466 = vmatprep.mubr.msk.f32.mxu0 %vm110_vm0, %v57_v46 }
  0x4c   :  { %2521 = vset.pattern.permute.xlu1 %v2774_v26 }
  0x4d   :  { %612 = vperm.xlu1 %2521, %v2871_v12  }
  0x4e   :  { %2467 = vmatmul.mubr.msk.f32.gmra.mxu0 %vm110_vm0, %v57_v46 }
  0x4f   :  { %2468 = vmatprep.mubr.msk.f32.mxu0 %vm110_vm0, %v58_v47 }
  0x51   :  { %620 = vperm.xlu1 %2521, %v2864_v11  }
  0x52   :  { %2469 = vmatmul.mubr.msk.f32.gmra.mxu0 %vm110_vm0, %v58_v47 }
  0x53   :  { %2470 = vmatprep.mubr.msk.f32.mxu0 %vm110_vm0, %v59_v48 }
  0x56   :  { %2471 = vmatmul.mubr.msk.f32.gmra.mxu0 %vm110_vm0, %v59_v48  ;;  %v2775_v48 = vmov 5  }
  0x57   :  { %2472 = vmatprep.mubr.msk.f32.mxu0 %vm110_vm0, %v60_v49  ;;  %2523 = vset.pattern.permute.xlu1 %v2775_v48 }
  0x58   :  { %2526 = vset.pattern.permute.xlu0 %v2775_v48  ;;  %782 = vperm.xlu1 %2523, %v2871_v12  }
  0x59   :  { %786 = vperm.xlu0 %2526, %v2884_v15  }
  0x5a   :  { %2473 = vmatmul.mubr.msk.f32.gmra.mxu0 %vm110_vm0, %v60_v49 }
  0x5b   :  { %2474 = vmatprep.mubr.msk.f32.mxu0 %vm110_vm0, %v61_v50 }
  0x5c   :  { %2524 = vset.pattern.permute.xlu1 %v2774_v26 }
  0x5d   :  { %798 = vperm.xlu0 %2526, %v2904_v20   ;;  %624 = vperm.xlu1 %2524, %v2899_v19  }
  0x5e   :  { %2475 = vmatmul.mubr.msk.f32.gmra.mxu0 %vm110_vm0, %v61_v50 }
  0x5f   :  { %2056 = vmatprep.mubr.f32.mxu0 %v4319_v55 }
  0x61   :  { %2529 = vset.pattern.permute.xlu0 %v2774_v26  ;;  %2525 = vset.pattern.permute.xlu1 %v2775_v48 }
  0x62   :  { %790 = vperm.xlu1 %2525, %v2864_v11   ;;  %640 = vperm.xlu0 %2529, %v2953_v30  }
  0x66   :  { %794 = vperm.xlu1 %2525, %v2899_v19  }
  0x6a   :  { %2527 = vset.pattern.permute.xlu1 %v2774_v26 }
  0x6b   :  { %632 = vperm.xlu1 %2527, %v2945_v28  }
  0x6f   :  { %636 = vperm.xlu1 %2527, %v2966_v32  }
  0x73   :  { %2528 = vset.pattern.permute.xlu1 %v2775_v48 }
  0x74   :  { %802 = vperm.xlu1 %2528, %v2945_v28  }
  0x78   :  { %806 = vperm.xlu1 %2528, %v2966_v32  }
  0x7c   :  { %810 = vperm.xlu1 %2528, %v2953_v30  }
  0x7f   :  { %v83_v51 = vpop.permute.xlu1 %82 }
  0x82   :  { %v73_v54 = vpop.permute.xlu0 %72 }
  0x8d   :  { %v78_v57 = vpop.permute.xlu0 %77 }
  0x8e   :  { %v346_v52 = vpop.permute.xlu1 %345 }
  0x91   :  { %v93_v59 = vpop.permute.xlu0 %92 }
  0x93   :  { %v88_v53 = vpop.permute.xlu1 %87 }
  0x96   :  { %v350_v0 = vpop.permute.xlu0 %349 }
  0x98   :  { %v354_v56 = vpop.permute.xlu1 %353 }
  0x9a   :  { %v362_v36 = vpop.permute.xlu0 %361 }
  0x9c   :  { %v358_v58 = vpop.permute.xlu1 %357 }
  0xa1   :  { %v3061_v60 = vpop.permute.xlu1 %97 }
  0xa5   :  { %v3067_v3 = vpop.permute.xlu1 %102 }
  0xaa   :  { %v366_v17 = vpop.permute.xlu1 %365 }
  0xae   :  { %v370_v33 = vpop.permute.xlu1 %369 }
  0xb2   :  { %v374_v44 = vpop.permute.xlu1 %373 }
 0x102   :  { %v297_v61 = vpop.f32.mrf.mxu0 }
 0x103   :  { %v3063_v62 = vadd.f32 %v297_v61, %v73_v54 }
 0x104   :  { %v299_v63 = vpop.f32.mrf.mxu0 }
 0x105   :  { %v3065_v1 = vadd.f32 %v299_v63, %v73_v54  ;;  %v3072_v5 = vmul.f32 %v346_v52, %v3063_v62 }
 0x106   :  { %v303_v2 = vpop.f32.mrf.mxu0 }
 0x107   :  { %v3069_v4 = vadd.f32 %v303_v2, %v78_v57  ;;  %v3080_v9 = vmul.f32 %v346_v52, %v3065_v1 }
 0x108   :  { %v305_v6 = vpop.f32.mrf.mxu0 }
 0x109   :  { %v3075_v7 = vmul.f32 %v350_v0, %v3069_v4  ;;  %v3077_v8 = vadd.f32 %v305_v6, %v78_v57  ;;  %v446_v6 = vpop.permute.xlu1 %445 }
 0x10a   :  { %v309_v10 = vpop.f32.mrf.mxu0 }
 0x10b   :  { %2556 = vtanh.f32 %v3075_v7  ;;  %v3084_v13 = vmul.f32 %v350_v0, %v3077_v8  ;;  %v3086_v14 = vadd.f32 %v309_v10, %v83_v51 }
 0x10c   :  { %2558 = vtanh.f32 %v3072_v5  ;;  %v311_v16 = vpop.f32.mrf.mxu0 }
 0x10d   :  { %2560 = vtanh.f32 %v3084_v13  ;;  %v3091_v18 = vmul.f32 %v354_v56, %v3086_v14  ;;  %v3093_v21 = vadd.f32 %v311_v16, %v83_v51 }
 0x10e   :  { %2562 = vtanh.f32 %v3080_v9  ;;  %v315_v22 = vpop.f32.mrf.mxu0 }
 0x10f   :  { %2564 = vtanh.f32 %v3091_v18  ;;  %v3098_v23 = vmul.f32 %v354_v56, %v3093_v21  ;;  %v3100_v24 = vadd.f32 %v315_v22, %v88_v53 }
 0x110   :  { %v317_v25 = vpop.f32.mrf.mxu0 }
 0x111   :  { %2566 = vtanh.f32 %v3098_v23  ;;  %v3106_v27 = vmul.f32 %v358_v58, %v3100_v24  ;;  %v3108_v29 = vadd.f32 %v317_v25, %v88_v53 }
 0x112   :  { %v321_v31 = vpop.f32.mrf.mxu0 }
 0x113   :  { %v3113_v34 = vmul.f32 %v358_v58, %v3108_v29  ;;  %v3115_v35 = vadd.f32 %v321_v31, %v93_v59  ;;  %2568 = vtanh.f32 %v3106_v27 }
 0x114   :  { %v323_v37 = vpop.f32.mrf.mxu0 }
 0x115   :  { %2570 = vtanh.f32 %v3113_v34  ;;  %v3120_v38 = vmul.f32 %v362_v36, %v3115_v35  ;;  %v3122_v39 = vadd.f32 %v323_v37, %v93_v59 }
 0x116   :  { %v327_v40 = vpop.f32.mrf.mxu0 }
 0x117   :  { %2572 = vtanh.f32 %v3120_v38  ;;  %v3128_v41 = vmul.f32 %v362_v36, %v3122_v39  ;;  %v3131_v42 = vadd.f32 %v327_v40, %v3061_v60 }
 0x118   :  { %v2557_v43 = vpop.eup %2556  ;;  %v329_v45 = vpop.f32.mrf.mxu0 }
 0x119   :  { %v2559_v46 = vpop.eup %2558  ;;  %2574 = vtanh.f32 %v3128_v41  ;;  %v3135_v47 = vmul.f32 %v366_v17, %v3131_v42  ;;  %v3140_v50 = vadd.f32 %v329_v45, %v3061_v60  ;;  %v410_v53 = vadd.f32 1.0, %v2557_v43  ;;  %v108_v60 = vpop.permute.xlu0 %107 }
 0x11a   :  { %v2561_v49 = vpop.eup %2560  ;;  %v333_v51 = vpop.f32.mrf.mxu0  ;;  %v408_v61 = vadd.f32 1.0, %v2559_v46 }
 0x11b   :  { %v2563_v52 = vpop.eup %2562  ;;  %2576 = vtanh.f32 %v3135_v47  ;;  %v3146_v56 = vmul.f32 %v366_v17, %v3140_v50  ;;  %v3149_v57 = vadd.f32 %v333_v51, %v3067_v3  ;;  %v411_v59 = vadd.f32 1.0, %v2561_v49 }
 0x11c   :  { %v2565_v54 = vpop.eup %2564  ;;  %v335_v58 = vpop.f32.mrf.mxu0  ;;  %v409_v0 = vadd.f32 1.0, %v2563_v52  ;;  %v426_v17 = vmul.f32 %v410_v53, %v3075_v7  ;;  %v424_v43 = vmul.f32 %v408_v61, %v3072_v5 }
 0x11d   :  { %2578 = vtanh.f32 %v3146_v56  ;;  %v3153_v2 = vmul.f32 %v370_v33, %v3149_v57  ;;  %v3156_v10 = vadd.f32 %v335_v58, %v3067_v3  ;;  %v412_v22 = vadd.f32 1.0, %v2565_v54  ;;  %v442_v51 = vpop.permute.xlu0 %441 }
 0x11e   :  { %v2567_v63 = vpop.eup %2566  ;;  %v339_v16 = vpop.f32.mrf.mxu0  ;;  %v427_v37 = vmul.f32 %v411_v59, %v3084_v13  ;;  %v425_v7 = vmul.f32 %v409_v0, %v3080_v9  ;;  %v3179_v52 = vmul.f32 %v446_v6, %v426_v17  ;;  %v3191_v61 = vmul.f32 %v442_v51, %v424_v43 }
 0x11f   :  { %2580 = vtanh.f32 %v3153_v2  ;;  %v3164_v25 = vmul.f32 %v370_v33, %v3156_v10  ;;  %v3166_v31 = vadd.f32 %v339_v16, %v108_v60  ;;  %v413_v40 = vadd.f32 1.0, %v2567_v63  ;;  %v450_v9 = vpop.permute.xlu1 %449 }
 0x120   :  { %v341_v36 = vpop.f32.mrf.mxu0  ;;  %v2569_v3 = vpop.eup %2568  ;;  %v428_v33 = vmul.f32 %v412_v22, %v3091_v18  ;;  %v3189_v59 = vmul.f32 %v446_v6, %v427_v37  ;;  %v3193_v63 = vmul.f32 %v442_v51, %v425_v7  ;;  %v519_v6 = vmul.f32 %v3179_v52, %v3179_v52 }
 0x121   :  { %2582 = vtanh.f32 %v3164_v25  ;;  %v3173_v46 = vmul.f32 %v374_v44, %v3166_v31  ;;  %v3175_v49 = vadd.f32 %v341_v36, %v108_v60  ;;  %v414_v53 = vadd.f32 1.0, %v2569_v3  ;;  %v454_v36 = vpop.permute.xlu0 %453 }
 0x122   :  { %v2571_v45 = vpop.eup %2570  ;;  %v429_v18 = vmul.f32 %v413_v40, %v3098_v23  ;;  %v3197_v16 = vmul.f32 %v450_v9, %v428_v33  ;;  %v2776_v3 = vmov 4   ;;  %v518_v43 = vmul.f32 %v3193_v63, %v3193_v63 }
 0x123   :  { %4322 = vst [vmem:[#allocation6_spill] sm:$0xff] %v3175_v49  ;;  %2584 = vtanh.f32 %v3173_v46  ;;  %v3184_v13 = vmul.f32 %v374_v44, %v3175_v49  ;;  %v415_v54 = vadd.f32 1.0, %v2571_v45  ;;  %v430_v44 = vmul.f32 %v414_v53, %v3106_v27  ;;  %2530 = vset.pattern.permute.xlu0 %v2776_v3  ;;  %2531 = vset.pattern.permute.xlu1 %v2776_v3 }
 0x124   :  { %v2573_v5 = vpop.eup %2572  ;;  %v520_v27 = vmul.f32 %v3189_v59, %v3189_v59  ;;  %v3207_v37 = vmul.f32 %v450_v9, %v429_v18  ;;  %878 = vperm.xlu0 %2530, %v2871_v12   ;;  %v488_v33 = vadd.f32 %v3179_v52, %v3191_v61  ;;  %v521_v51 = vmul.f32 %v3197_v16, %v3197_v16  ;;  %v458_v9 = vpop.permute.xlu1 %457 }
 0x125   :  { %v416_v58 = vadd.f32 1.0, %v2573_v5  ;;  %2586 = vtanh.f32 %v3184_v13  ;;  %v431_v17 = vmul.f32 %v415_v54, %v3113_v34  ;;  %v3215_v45 = vmul.f32 %v454_v36, %v430_v44  ;;  %882 = vperm.xlu1 %2531, %v2884_v15  }
 0x126   :  { %v2575_v60 = vpop.eup %2574  ;;  %v501_v53 = vadd.f32 %v3189_v59, %v3193_v63  ;;  %v546_v44 = vadd.f32 %v520_v27, %v518_v43 }
 0x127   :  { %v417_v0 = vadd.f32 1.0, %v2575_v60  ;;  %v432_v23 = vmul.f32 %v416_v58, %v3120_v38  ;;  %v517_v38 = vmul.f32 %v3191_v61, %v3191_v61  ;;  %v3221_v5 = vmul.f32 %v454_v36, %v431_v17 }
 0x128   :  { %v2577_v22 = vpop.eup %2576  ;;  %v522_v17 = vmul.f32 %v3207_v37, %v3207_v37  ;;  %890 = vperm.xlu0 %2530, %v2899_v19   ;;  %v502_v27 = vadd.f32 %v501_v53, %v3207_v37 }
 0x129   :  { %v418_v40 = vadd.f32 1.0, %v2577_v22  ;;  %v433_v34 = vmul.f32 %v417_v0, %v3128_v41  ;;  %v533_v54 = vadd.f32 %v519_v6, %v517_v38  ;;  %v3226_v18 = vmul.f32 %v458_v9, %v432_v23  ;;  %v462_v6 = vpop.permute.xlu0 %461  ;;  %886 = vperm.xlu1 %2531, %v2864_v11  }
 0x12a   :  { %v2579_v7 = vpop.eup %2578  ;;  %v489_v0 = vadd.f32 %v488_v33, %v3197_v16  ;;  %v523_v22 = vmul.f32 %v3215_v45, %v3215_v45  ;;  %v524_v38 = vmul.f32 %v3221_v5, %v3221_v5  ;;  %v503_v53 = vadd.f32 %v502_v27, %v3221_v5 }
 0x12b   :  { %v434_v41 = vmul.f32 %v418_v40, %v3135_v47  ;;  %v419_v58 = vadd.f32 1.0, %v2579_v7  ;;  %v3236_v23 = vmul.f32 %v458_v9, %v433_v34  ;;  %v534_v40 = vadd.f32 %v533_v54, %v521_v51  ;;  %v466_v51 = vpop.permute.xlu1 %465 }
 0x12c   :  { %v2581_v60 = vpop.eup %2580  ;;  %v525_v33 = vmul.f32 %v3226_v18, %v3226_v18  ;;  %898 = vperm.xlu0 %2530, %v2945_v28  }
 0x12d   :  { %v420_v47 = vadd.f32 1.0, %v2581_v60  ;;  %v435_v26 = vmul.f32 %v419_v58, %v3146_v56  ;;  %v3242_v43 = vmul.f32 %v462_v6, %v434_v41  ;;  %v547_v60 = vadd.f32 %v546_v44, %v522_v17  ;;  %894 = vperm.xlu1 %2531, %v2904_v20  }
 0x12e   :  { %v2583_v36 = vpop.eup %2582  ;;  %v490_v56 = vadd.f32 %v489_v0, %v3215_v45  ;;  %v526_v54 = vmul.f32 %v3236_v23, %v3236_v23 }
 0x12f   :  { %v436_v19 = vmul.f32 %v420_v47, %v3153_v2  ;;  %v421_v7 = vadd.f32 1.0, %v2583_v36  ;;  %v3247_v34 = vmul.f32 %v462_v6, %v435_v26  ;;  %v535_v2 = vadd.f32 %v534_v40, %v523_v22 }
 0x130   :  { %v2585_v9 = vpop.eup %2584  ;;  %v548_v6 = vadd.f32 %v547_v60, %v524_v38  ;;  %v491_v44 = vadd.f32 %v490_v56, %v3226_v18  ;;  %v527_v0 = vmul.f32 %v3242_v43, %v3242_v43  ;;  %v504_v26 = vadd.f32 %v503_v53, %v3236_v23  ;;  %906 = vperm.xlu0 %2530, %v2953_v30   ;;  %v470_v60 = vpop.permute.xlu0 %469 }
 0x131   :  { %v437_v41 = vmul.f32 %v421_v7, %v3164_v25  ;;  %v3256_v58 = vmul.f32 %v466_v51, %v436_v19  ;;  %v422_v17 = vadd.f32 1.0, %v2585_v9  ;;  %v536_v36 = vadd.f32 %v535_v2, %v525_v33  ;;  %902 = vperm.xlu1 %2531, %v2966_v32  }
 0x132   :  { %v2587_v47 = vpop.eup %2586  ;;  %v528_v25 = vmul.f32 %v3247_v34, %v3247_v34  ;;  %v492_v27 = vadd.f32 %v491_v44, %v3242_v43  ;;  %v549_v7 = vadd.f32 %v548_v6, %v526_v54  ;;  %v505_v33 = vadd.f32 %v504_v26, %v3247_v34 }
 0x133   :  { %v3264_v22 = vmul.f32 %v466_v51, %v437_v41  ;;  %v529_v40 = vmul.f32 %v3256_v58, %v3256_v58  ;;  %v423_v38 = vadd.f32 1.0, %v2587_v47  ;;  %v438_v19 = vmul.f32 %v422_v17, %v3173_v46 }
 0x134   :  { %v537_v56 = vadd.f32 %v536_v36, %v527_v0  ;;  %v493_v53 = vadd.f32 %v492_v27, %v3256_v58  ;;  %v550_v46 = vadd.f32 %v549_v7, %v528_v25 }
 0x135   :  { %v530_v9 = vmul.f32 %v3264_v22, %v3264_v22  ;;  %v439_v51 = vmul.f32 %v423_v38, %v3184_v13  ;;  %v3278_v41 = vmul.f32 %v470_v60, %v438_v19  ;;  %v506_v48 = vadd.f32 %v505_v33, %v3264_v22 }
 0x136   :  { %v538_v2 = vadd.f32 %v537_v56, %v529_v40 }
 0x137   :  { %v487_v54 = vmul.f32 %v470_v60, %v439_v51  ;;  %v494_v47 = vadd.f32 %v493_v53, %v3278_v41  ;;  %v531_v6 = vmul.f32 %v3278_v41, %v3278_v41  ;;  %v551_v44 = vadd.f32 %v550_v46, %v530_v9 }
 0x139   :  { %v495_v28 = vrot.slane %v494_v47, 4  ;;  %v507_v0 = vadd.f32 %v506_v48, %v487_v54  ;;  %v532_v17 = vmul.f32 %v487_v54, %v487_v54  ;;  %v539_v26 = vadd.f32 %v538_v2, %v531_v6 }
 0x13b   :  { %v496_v13 = vadd.f32 %v495_v28, %v494_v47  ;;  %v508_v36 = vrot.slane %v507_v0, 4  ;;  %v540_v27 = vrot.slane %v539_v26, 4  ;;  %v552_v25 = vadd.f32 %v551_v44, %v532_v17 }
 0x13d   :  { %v497_v40 = vrot.slane %v496_v13, 2  ;;  %v509_v38 = vadd.f32 %v508_v36, %v507_v0  ;;  %v541_v19 = vadd.f32 %v540_v27, %v539_v26  ;;  %v553_v7 = vrot.slane %v552_v25, 4 }
 0x13f   :  { %v498_v33 = vadd.f32 %v497_v40, %v496_v13  ;;  %v510_v60 = vrot.slane %v509_v38, 2  ;;  %v542_v56 = vrot.slane %v541_v19, 2  ;;  %v554_v9 = vadd.f32 %v553_v7, %v552_v25 }
 0x141   :  { %v499_v53 = vrot.slane %v498_v33, 1  ;;  %v511_v51 = vadd.f32 %v510_v60, %v509_v38  ;;  %v543_v46 = vadd.f32 %v542_v56, %v541_v19  ;;  %v555_v48 = vrot.slane %v554_v9, 2 }
 0x143   :  { %v500_v2 = vadd.f32 %v499_v53, %v498_v33  ;;  %v512_v47 = vrot.slane %v511_v51, 1  ;;  %v544_v6 = vrot.slane %v543_v46, 1  ;;  %v556_v30 = vadd.f32 %v555_v48, %v554_v9 }
 0x145   :  { %v513_v44 = vadd.f32 %v512_v47, %v511_v51  ;;  %v3288_v28 = vmul.f32 0.015625, %v500_v2  ;;  %v545_v0 = vadd.f32 %v544_v6, %v543_v46  ;;  %v557_v17 = vrot.slane %v556_v30, 1 }
 0x147   :  { %v516_v26 = vmul.f32 0.015625, %v513_v44  ;;  %v558_v13 = vadd.f32 %v557_v17, %v556_v30  ;;  %v559_v3 = vmul.f32 0.015625, %v545_v0  ;;  %v561_v36 = vmul.f32 %v3288_v28, %v3288_v28 }
 0x148   :  { %v581_v53 = vsub.f32 %v3278_v41, %v3288_v28  ;;  %v579_v20 = vsub.f32 %v3256_v58, %v3288_v28  ;;  %v573_v0 = vsub.f32 %v3215_v45, %v3288_v28 }
 0x149   :  { %v560_v27 = vmul.f32 0.015625, %v558_v13  ;;  %v562_v25 = vmul.f32 %v516_v26, %v516_v26  ;;  %v563_v40 = vsub.f32 %v559_v3, %v561_v36  ;;  %v582_v56 = vsub.f32 %v487_v54, %v516_v26 }
 0x14a   :  { %v580_v46 = vsub.f32 %v3264_v22, %v516_v26  ;;  %v578_v32 = vsub.f32 %v3247_v34, %v516_v26  ;;  %v577_v54 = vsub.f32 %v3242_v43, %v3288_v28  ;;  %v576_v41 = vsub.f32 %v3236_v23, %v516_v26 }
 0x14b   :  { %v564_v38 = vsub.f32 %v560_v27, %v562_v25  ;;  %v565_v19 = vmax.f32 %v563_v40, 0.0  ;;  %v575_v22 = vsub.f32 %v3226_v18, %v3288_v28  ;;  %v574_v44 = vsub.f32 %v3221_v5, %v516_v26 }
 0x14c   :  { %v572_v17 = vsub.f32 %v3207_v37, %v516_v26  ;;  %v571_v13 = vsub.f32 %v3197_v16, %v3288_v28  ;;  %v570_v3 = vsub.f32 %v3189_v59, %v516_v26  ;;  %v569_v36 = vsub.f32 %v3179_v52, %v3288_v28  ;;  %v603_v59 = vld [vmem:[%s4315_s2] sm:$0xff]  ;;  %v604_v52 = vld [vmem:[%s4315_s2 + $0x8] sm:$0xff] }
 0x14d   :  { %v566_v7 = vmax.f32 %v564_v38, 0.0  ;;  %v583_v33 = vadd.f32 1e-05, %v565_v19  ;;  %v568_v27 = vsub.f32 %v3193_v63, %v516_v26  ;;  %v567_v25 = vsub.f32 %v3191_v61, %v3288_v28  ;;  %v605_v61 = vld [vmem:[%s4315_s2 + $0x10] sm:$0xff]  ;;  %v606_v63 = vld [vmem:[%s4315_s2 + $0x18] sm:$0xff]  ;;  %v607_v28 = vld [vmem:[%s4315_s2 + $0x20] sm:$0xff] }
 0x14e   :  { %v608_v26 = vld [vmem:[%s4315_s2 + $0x28] sm:$0xff]  ;;  %v609_v38 = vld [vmem:[%s4315_s2 + $0x30] sm:$0xff]  ;;  %v610_v19 = vld [vmem:[%s4315_s2 + $0x38] sm:$0xff] }
 0x14f   :  { %v584_v60 = vadd.f32 1e-05, %v566_v7  ;;  %2588 = vrsqrt.f32 %v583_v33  ;;  %v613_v7 = vpop.permute.xlu1 %612 }
 0x151   :  { %2590 = vrsqrt.f32 %v584_v60 }
 0x153   :  { %v621_v33 = vpop.permute.xlu1 %620 }
 0x157   :  { %v783_v60 = vpop.permute.xlu1 %782 }
 0x15c   :  { %v2589_v11 = vpop.eup %2588 }
 0x15d   :  { %v601_v48 = vmul.f32 %v2589_v11, %v581_v53  ;;  %v599_v47 = vmul.f32 %v2589_v11, %v579_v20  ;;  %v597_v30 = vmul.f32 %v2589_v11, %v577_v54  ;;  %v595_v34 = vmul.f32 %v2589_v11, %v575_v22  ;;  %v617_v53 = vpop.permute.xlu0 %616 }
 0x15e   :  { %v2591_v9 = vpop.eup %2590  ;;  %v593_v23 = vmul.f32 %v2589_v11, %v573_v0  ;;  %v591_v5 = vmul.f32 %v2589_v11, %v571_v13  ;;  %v589_v37 = vmul.f32 %v2589_v11, %v569_v36  ;;  %v587_v40 = vmul.f32 %v2589_v11, %v567_v25  ;;  %v625_v11 = vpop.permute.xlu1 %624 }
 0x15f   :  { %v602_v51 = vmul.f32 %v2591_v9, %v582_v56  ;;  %v600_v2 = vmul.f32 %v2591_v9, %v580_v46  ;;  %v598_v6 = vmul.f32 %v2591_v9, %v578_v32  ;;  %v596_v58 = vmul.f32 %v2591_v9, %v576_v41 }
 0x160   :  { %v594_v43 = vmul.f32 %v2591_v9, %v574_v44  ;;  %v592_v18 = vmul.f32 %v2591_v9, %v572_v17  ;;  %v590_v45 = vmul.f32 %v2591_v9, %v570_v3  ;;  %v588_v16 = vmul.f32 %v2591_v9, %v568_v27 }
 0x161   :  { %684 = vmatprep.subr.mxu1 %v602_v51  ;;  %v629_v46 = vpop.permute.xlu0 %628  ;;  %v2777_v36 = vmov 6  }
 0x162   :  { %685 = vmatpush1.msra.mxu1 %v601_v48  ;;  %v791_v56 = vpop.permute.xlu1 %790  ;;  %2532 = vset.pattern.permute.xlu1 %v2777_v36 }
 0x163   :  { %686 = vmatprep.subr.mxu1 %v600_v2  ;;  %2533 = vset.pattern.permute.xlu0 %v2777_v36 }
 0x164   :  { %687 = vmatpush1.msra.mxu1 %v599_v47  ;;  %1049 = vperm.xlu1 %2532, %v2871_v12   ;;  %v2778_v12 = vmov 8  }
 0x165   :  { %688 = vmatprep.subr.mxu1 %v598_v6  ;;  %v787_v41 = vpop.permute.xlu0 %786  ;;  %1053 = vperm.xlu0 %2533, %v2884_v15  }
 0x166   :  { %689 = vmatpush1.msra.mxu1 %v597_v30  ;;  %v795_v9 = vpop.permute.xlu1 %794 }
 0x167   :  { %690 = vmatprep.subr.mxu1 %v596_v58 }
 0x168   :  { %691 = vmatpush1.msra.mxu1 %v595_v34 }
 0x169   :  { %692 = vmatprep.subr.mxu1 %v594_v43  ;;  %2534 = vset.pattern.permute.xlu0 %v2778_v12  ;;  %v799_v15 = vpop.permute.xlu0 %798 }
 0x16a   :  { %693 = vmatpush1.msra.mxu1 %v593_v23  ;;  %v3358_v51 = vpop.permute.xlu1 %632 }
 0x16b   :  { %694 = vmatprep.subr.mxu1 %v592_v18 }
 0x16c   :  { %695 = vmatpush1.msra.mxu1 %v591_v5 }
 0x16d   :  { %696 = vmatprep.subr.mxu1 %v590_v45 }
 0x16e   :  { %697 = vmatpush1.msra.mxu1 %v589_v37  ;;  %v3360_v47 = vpop.permute.xlu1 %636 }
 0x16f   :  { %698 = vmatprep.subr.mxu1 %v588_v16 }
 0x170   :  { %699 = vmatpush1.msra.mxu1 %v587_v40 }
 0x171   :  { %2372 = vmatmul.mubr.msk.f32.vlgmr.msra.gmra.mxu1 %vm643_vm1, %v603_v59 }
 0x172   :  { %738 = vmatprep.mubr.f32.mxu1 %v4319_v55  ;;  %v803_v23 = vpop.permute.xlu1 %802 }
 0x175   :  { %2373 = vmatmul.mubr.msk.f32.gmra.mxu1 %vm643_vm1, %v604_v52 }
 0x176   :  { %744 = vmatprep.mubr.f32.mxu1 %v4319_v55  ;;  %v807_v40 = vpop.permute.xlu1 %806 }
 0x179   :  { %2374 = vmatmul.mubr.msk.f32.gmra.mxu1 %vm643_vm1, %v605_v61 }
 0x17a   :  { %750 = vmatprep.mubr.f32.mxu1 %v4319_v55 }
 0x17d   :  { %2375 = vmatmul.mubr.msk.f32.gmra.mxu1 %vm643_vm1, %v606_v63  ;;  %v3392_v63 = vld [vmem:[%s4316_s3 + $0x10] sm:$0xff] }
 0x17e   :  { %756 = vmatprep.mubr.f32.mxu1 %v4319_v55  ;;  %1057 = vperm.xlu1 %2532, %v3392_v63  }
 0x181   :  { %2376 = vmatmul.mubr.msk.f32.gmra.mxu1 %vm643_vm1, %v607_v28 }
 0x182   :  { %762 = vmatprep.mubr.f32.mxu1 %v4319_v55 }
 0x185   :  { %2377 = vmatmul.mubr.msk.f32.gmra.mxu1 %vm643_vm1, %v608_v26  ;;  %v3399_v26 = vld [vmem:[%s4316_s3] sm:$0xff] }
 0x186   :  { %768 = vmatprep.mubr.f32.mxu1 %v4319_v55  ;;  %1234 = vperm.xlu0 %2534, %v3399_v26  }
 0x189   :  { %2378 = vmatmul.mubr.msk.f32.gmra.mxu1 %vm643_vm1, %v609_v38 }
 0x18a   :  { %774 = vmatprep.mubr.f32.mxu1 %v4319_v55  ;;  %1242 = vperm.xlu0 %2534, %v3392_v63  }
 0x18d   :  { %2379 = vmatmul.mubr.msk.f32.gmra.mxu1 %vm643_vm1, %v610_v19 }
 0x18e   :  { %1168 = vmatprep.mubr.f32.mxu1 %v4319_v55 }
 0x231   :  { %v734_v48 = vpop.f32.mrf.mxu1 }
 0x232   :  { %v735_v20 = vadd.f32 %v734_v48, %v613_v7 }
 0x233   :  { %v736_v2 = vpop.f32.mrf.mxu1 }
 0x234   :  { %v737_v32 = vadd.f32 %v736_v2, %v613_v7  ;;  %v3362_v54 = vmul.f32 %v783_v60, %v735_v20 }
 0x235   :  { %v740_v6 = vpop.f32.mrf.mxu1 }
 0x236   :  { %v3364_v30 = vmul.f32 %v783_v60, %v737_v32  ;;  %v741_v22 = vadd.f32 %v740_v6, %v617_v53  ;;  %2592 = vtanh.f32 %v3362_v54  ;;  %v641_v6 = vpop.permute.xlu0 %640 }
 0x237   :  { %v742_v58 = vpop.f32.mrf.mxu1 }
 0x238   :  { %v3366_v44 = vmul.f32 %v787_v41, %v741_v22  ;;  %v743_v34 = vadd.f32 %v742_v58, %v617_v53  ;;  %2594 = vtanh.f32 %v3364_v30 }
 0x239   :  { %v746_v0 = vpop.f32.mrf.mxu1 }
 0x23a   :  { %v3370_v43 = vmul.f32 %v787_v41, %v743_v34  ;;  %v747_v17 = vadd.f32 %v746_v0, %v621_v33  ;;  %2596 = vtanh.f32 %v3366_v44 }
 0x23b   :  { %v748_v13 = vpop.f32.mrf.mxu1 }
 0x23c   :  { %2598 = vtanh.f32 %v3370_v43  ;;  %v3374_v18 = vmul.f32 %v791_v56, %v747_v17  ;;  %v749_v3 = vadd.f32 %v748_v13, %v621_v33 }
 0x23d   :  { %v752_v5 = vpop.f32.mrf.mxu1 }
 0x23e   :  { %2600 = vtanh.f32 %v3374_v18  ;;  %v3379_v45 = vmul.f32 %v791_v56, %v749_v3  ;;  %v753_v27 = vadd.f32 %v752_v5, %v625_v11  ;;  %v811_v56 = vpop.permute.xlu1 %810 }
 0x23f   :  { %v754_v37 = vpop.f32.mrf.mxu1 }
 0x240   :  { %2602 = vtanh.f32 %v3379_v45  ;;  %v3384_v25 = vmul.f32 %v795_v9, %v753_v27  ;;  %v755_v16 = vadd.f32 %v754_v37, %v625_v11 }
 0x241   :  { %v758_v59 = vpop.f32.mrf.mxu1 }
 0x242   :  { %2604 = vtanh.f32 %v3384_v25  ;;  %v3387_v52 = vmul.f32 %v795_v9, %v755_v16  ;;  %v759_v61 = vadd.f32 %v758_v59, %v629_v46  ;;  %v3412_v9 = vld [vmem:[%s4316_s3 + $0x18] sm:$0xff]  ;;  %v883_v27 = vpop.permute.xlu1 %882 }
 0x243   :  { %v760_v28 = vpop.f32.mrf.mxu1  ;;  %v2593_v33 = vpop.eup %2592  ;;  %1061 = vperm.xlu1 %2532, %v3412_v9   ;;  %1246 = vperm.xlu0 %2534, %v3412_v9  }
 0x244   :  { %2606 = vtanh.f32 %v3387_v52  ;;  %v3403_v38 = vmul.f32 %v799_v15, %v759_v61  ;;  %v761_v19 = vadd.f32 %v760_v28, %v629_v46  ;;  %v845_v41 = vadd.f32 1.0, %v2593_v33 }
 0x245   :  { %v764_v7 = vpop.f32.mrf.mxu1  ;;  %v2595_v53 = vpop.eup %2594 }
 0x246   :  { %2608 = vtanh.f32 %v3403_v38  ;;  %v3406_v60 = vmul.f32 %v799_v15, %v761_v19  ;;  %v765_v11 = vadd.f32 %v764_v7, %v3358_v51  ;;  %v846_v5 = vadd.f32 1.0, %v2595_v53 }
 0x247   :  { %v766_v48 = vpop.f32.mrf.mxu1  ;;  %v2597_v46 = vpop.eup %2596  ;;  %2535 = vset.pattern.permute.xlu1 %v2778_v12  ;;  %v861_v59 = vmul.f32 %v845_v41, %v3362_v54 }
 0x248   :  { %2610 = vtanh.f32 %v3406_v60  ;;  %v3417_v20 = vmul.f32 %v803_v23, %v765_v11  ;;  %v767_v2 = vadd.f32 %v766_v48, %v3358_v51  ;;  %v847_v17 = vadd.f32 1.0, %v2597_v46  ;;  %v3428_v51 = vld [vmem:[%s4316_s3 + $0x8] sm:$0xff]  ;;  %v879_v11 = vpop.permute.xlu0 %878 }
 0x249   :  { %v2599_v32 = vpop.eup %2598  ;;  %v770_v22 = vpop.f32.mrf.mxu1  ;;  %1238 = vperm.xlu1 %2535, %v3428_v51  }
 0x24a   :  { %2612 = vtanh.f32 %v3417_v20  ;;  %v3421_v58 = vmul.f32 %v803_v23, %v767_v2  ;;  %v771_v34 = vadd.f32 %v770_v22, %v3360_v47  ;;  %v848_v13 = vadd.f32 1.0, %v2599_v32  ;;  %v887_v32 = vpop.permute.xlu1 %886 }
 0x24b   :  { %v2601_v0 = vpop.eup %2600  ;;  %v772_v3 = vpop.f32.mrf.mxu1  ;;  %v863_v53 = vmul.f32 %v847_v17, %v3366_v44 }
 0x24c   :  { %2614 = vtanh.f32 %v3421_v58  ;;  %v3433_v23 = vmul.f32 %v807_v40, %v771_v34  ;;  %v773_v37 = vadd.f32 %v772_v3, %v3360_v47  ;;  %v849_v15 = vadd.f32 1.0, %v2601_v0 }
 0x24d   :  { %v2603_v16 = vpop.eup %2602  ;;  %v776_v61 = vpop.f32.mrf.mxu1  ;;  %v864_v48 = vmul.f32 %v848_v13, %v3370_v43  ;;  %2536 = vset.pattern.permute.xlu1 %v2777_v36  ;;  %v862_v47 = vmul.f32 %v846_v5, %v3364_v30  ;;  %v3456_v30 = vmul.f32 %v879_v11, %v861_v59  ;;  %v3461_v34 = vmul.f32 %v883_v27, %v863_v53 }
 0x24e   :  { %2616 = vtanh.f32 %v3433_v23  ;;  %v3438_v28 = vmul.f32 %v807_v40, %v773_v37  ;;  %v777_v19 = vadd.f32 %v776_v61, %v641_v6  ;;  %v850_v7 = vadd.f32 1.0, %v2603_v16  ;;  %v3450_v40 = vld [vmem:[%s4316_s3 + $0x20] sm:$0xff]  ;;  %v895_v53 = vpop.permute.xlu1 %894 }
 0x24f   :  { %v2605_v33 = vpop.eup %2604  ;;  %v778_v46 = vpop.f32.mrf.mxu1  ;;  %1065 = vperm.xlu1 %2536, %v3450_v40   ;;  %1250 = vperm.xlu0 %2534, %v3450_v40   ;;  %v865_v43 = vmul.f32 %v849_v15, %v3374_v18  ;;  %v3463_v0 = vmul.f32 %v883_v27, %v864_v48  ;;  %v3465_v13 = vmul.f32 %v879_v11, %v862_v47  ;;  %v3498_v47 = vld [vmem:[%s4316_s3 + $0x30] sm:$0xff] }
 0x250   :  { %2618 = vtanh.f32 %v3438_v28  ;;  %v3445_v54 = vmul.f32 %v811_v56, %v777_v19  ;;  %v779_v2 = vadd.f32 %v778_v46, %v641_v6  ;;  %v866_v36 = vmul.f32 %v850_v7, %v3379_v45  ;;  %v3472_v45 = vld [vmem:[%s4316_s3 + $0x28] sm:$0xff]  ;;  %v891_v27 = vpop.permute.xlu0 %890 }
 0x251   :  { %v2607_v44 = vpop.eup %2606  ;;  %v851_v41 = vadd.f32 1.0, %v2605_v33  ;;  %v3476_v3 = vmul.f32 %v887_v32, %v865_v43  ;;  %v955_v15 = vmul.f32 %v3461_v34, %v3461_v34  ;;  %v956_v19 = vmul.f32 %v3463_v0, %v3463_v0 }
 0x252   :  { %2620 = vtanh.f32 %v3445_v54  ;;  %v3459_v6 = vmul.f32 %v811_v56, %v779_v2  ;;  %v852_v17 = vadd.f32 1.0, %v2607_v44  ;;  %v3478_v5 = vmul.f32 %v887_v32, %v866_v36 }
 0x253   :  { %v2609_v22 = vpop.eup %2608  ;;  %v867_v18 = vmul.f32 %v851_v41, %v3384_v25  ;;  %1069 = vperm.xlu1 %2536, %v3472_v45   ;;  %1254 = vperm.xlu0 %2534, %v3472_v45   ;;  %v953_v25 = vmul.f32 %v3456_v30, %v3456_v30  ;;  %v954_v11 = vmul.f32 %v3465_v13, %v3465_v13 }
 0x254   :  { %2622 = vtanh.f32 %v3459_v6  ;;  %v868_v37 = vmul.f32 %v852_v17, %v3387_v52  ;;  %v853_v16 = vadd.f32 1.0, %v2609_v22  ;;  %v925_v44 = vadd.f32 %v3461_v34, %v3456_v30 }
 0x255   :  { %v2611_v56 = vpop.eup %2610  ;;  %v3487_v7 = vmul.f32 %v891_v27, %v867_v18  ;;  %v958_v43 = vmul.f32 %v3478_v5, %v3478_v5  ;;  %v938_v32 = vadd.f32 %v3463_v0, %v3465_v13 }
 0x256   :  { %v854_v59 = vadd.f32 1.0, %v2611_v56  ;;  %v869_v33 = vmul.f32 %v853_v16, %v3403_v38  ;;  %v3492_v52 = vmul.f32 %v891_v27, %v868_v37  ;;  %v3504_v38 = vld [vmem:[%s4316_s3 + $0x38] sm:$0xff]  ;;  %v969_v56 = vadd.f32 %v955_v15, %v953_v25 }
 0x257   :  { %v2613_v61 = vpop.eup %2612  ;;  %1073 = vperm.xlu1 %2536, %v3498_v47   ;;  %1262 = vperm.xlu0 %2534, %v3504_v38   ;;  %v982_v27 = vadd.f32 %v956_v19, %v954_v11  ;;  %v926_v37 = vadd.f32 %v925_v44, %v3476_v3  ;;  %v959_v16 = vmul.f32 %v3487_v7, %v3487_v7 }
 0x258   :  { %v870_v48 = vmul.f32 %v854_v59, %v3406_v60  ;;  %v855_v46 = vadd.f32 1.0, %v2613_v61  ;;  %v957_v60 = vmul.f32 %v3476_v3, %v3476_v3  ;;  %v3513_v36 = vmul.f32 %v895_v53, %v869_v33  ;;  %v899_v59 = vpop.permute.xlu0 %898 }
 0x259   :  { %v2615_v2 = vpop.eup %2614  ;;  %v939_v61 = vadd.f32 %v938_v32, %v3478_v5  ;;  %v960_v33 = vmul.f32 %v3492_v52, %v3492_v52  ;;  %v983_v15 = vadd.f32 %v982_v27, %v958_v43 }
 0x25a   :  { %v3517_v41 = vmul.f32 %v895_v53, %v870_v48  ;;  %v856_v22 = vadd.f32 1.0, %v2615_v2  ;;  %v871_v17 = vmul.f32 %v855_v46, %v3417_v20  ;;  %v970_v25 = vadd.f32 %v969_v56, %v957_v60 }
 0x25b   :  { %v2617_v18 = vpop.eup %2616  ;;  %1077 = vperm.xlu1 %2536, %v3504_v38   ;;  %v961_v19 = vmul.f32 %v3513_v36, %v3513_v36  ;;  %v2779_v46 = vmov 7   ;;  %v927_v2 = vadd.f32 %v926_v37, %v3487_v7  ;;  %v940_v44 = vadd.f32 %v939_v61, %v3492_v52  ;;  %v903_v61 = vpop.permute.xlu1 %902 }
 0x25c   :  { %v872_v53 = vmul.f32 %v856_v22, %v3421_v58  ;;  %v3527_v48 = vmul.f32 %v899_v59, %v871_v17  ;;  %v857_v11 = vadd.f32 1.0, %v2617_v18  ;;  %2539 = vset.pattern.permute.xlu0 %v2779_v46  ;;  %v962_v58 = vmul.f32 %v3517_v41, %v3517_v41 }
 0x25d   :  { %v2619_v20 = vpop.eup %2618  ;;  %1334 = vperm.xlu0 %2539, %v3428_v51   ;;  %v971_v60 = vadd.f32 %v970_v25, %v959_v16  ;;  %v984_v56 = vadd.f32 %v983_v15, %v960_v33  ;;  %v928_v27 = vadd.f32 %v927_v2, %v3513_v36  ;;  %v941_v37 = vadd.f32 %v940_v44, %v3517_v41  ;;  %v907_v2 = vpop.permute.xlu0 %906 }
 0x25e   :  { %v3536_v32 = vmul.f32 %v899_v59, %v872_v53  ;;  %v963_v43 = vmul.f32 %v3527_v48, %v3527_v48  ;;  %v858_v17 = vadd.f32 1.0, %v2619_v20  ;;  %v873_v18 = vmul.f32 %v857_v11, %v3433_v23 }
 0x25f   :  { %v2621_v22 = vpop.eup %2620  ;;  %2537 = vset.pattern.permute.xlu1 %v2778_v12  ;;  %v972_v53 = vadd.f32 %v971_v60, %v961_v19  ;;  %v985_v23 = vadd.f32 %v984_v56, %v962_v58  ;;  %v929_v33 = vadd.f32 %v928_v27, %v3527_v48 }
 0x260   :  { %v859_v55 = vadd.f32 1.0, %v2621_v22  ;;  %v964_v16 = vmul.f32 %v3536_v32, %v3536_v32  ;;  %v874_v25 = vmul.f32 %v858_v17, %v3438_v28  ;;  %v3548_v49 = vmul.f32 %v903_v61, %v873_v18  ;;  %1258 = vperm.xlu1 %2537, %v3498_v47  }
 0x261   :  { %v2623_v59 = vpop.eup %2622  ;;  %1346 = vperm.xlu0 %2539, %v3450_v40   ;;  %v942_v12 = vadd.f32 %v941_v37, %v3536_v32  ;;  %v973_v19 = vadd.f32 %v972_v53, %v963_v43 }
 0x262   :  { %v860_v20 = vadd.f32 1.0, %v2623_v59  ;;  %v875_v15 = vmul.f32 %v859_v55, %v3445_v54  ;;  %v3555_v11 = vmul.f32 %v903_v61, %v874_v25  ;;  %v965_v28 = vmul.f32 %v3548_v49, %v3548_v49 }
 0x263   :  { %v930_v44 = vadd.f32 %v929_v33, %v3548_v49  ;;  %v986_v60 = vadd.f32 %v985_v23, %v964_v16 }
 0x264   :  { %v876_v58 = vmul.f32 %v860_v20, %v3459_v6  ;;  %v3561_v22 = vmul.f32 %v907_v2, %v875_v15  ;;  %v943_v55 = vadd.f32 %v942_v12, %v3555_v11  ;;  %v966_v54 = vmul.f32 %v3555_v11, %v3555_v11  ;;  %2538 = vset.pattern.permute.xlu1 %v2779_v46 }
 0x265   :  { %v974_v17 = vadd.f32 %v973_v19, %v965_v28  ;;  %1330 = vperm.xlu1 %2538, %v3399_v26   ;;  %1354 = vperm.xlu0 %2539, %v3498_v47  }
 0x266   :  { %v924_v43 = vmul.f32 %v907_v2, %v876_v58  ;;  %v931_v18 = vadd.f32 %v930_v44, %v3561_v22  ;;  %v967_v56 = vmul.f32 %v3561_v22, %v3561_v22  ;;  %v987_v6 = vadd.f32 %v986_v60, %v966_v54 }
 0x268   :  { %v932_v27 = vrot.slane %v931_v18, 4  ;;  %v944_v37 = vadd.f32 %v943_v55, %v924_v43  ;;  %v968_v61 = vmul.f32 %v924_v43, %v924_v43  ;;  %v975_v59 = vadd.f32 %v974_v17, %v967_v56 }
 0x269   :  { %1338 = vperm.xlu1 %2538, %v3392_v63  }
 0x26a   :  { %v933_v53 = vadd.f32 %v932_v27, %v931_v18  ;;  %v945_v16 = vrot.slane %v944_v37, 4  ;;  %v976_v25 = vrot.slane %v975_v59, 4  ;;  %v988_v23 = vadd.f32 %v987_v6, %v968_v61 }
 0x26c   :  { %v934_v46 = vrot.slane %v933_v53, 2  ;;  %v946_v33 = vadd.f32 %v945_v16, %v944_v37  ;;  %v977_v20 = vadd.f32 %v976_v25, %v975_v59  ;;  %v989_v15 = vrot.slane %v988_v23, 4 }
 0x26d   :  { %1342 = vperm.xlu1 %2538, %v3412_v9  }
 0x26e   :  { %v935_v12 = vadd.f32 %v934_v46, %v933_v53  ;;  %v947_v19 = vrot.slane %v946_v33, 2  ;;  %v978_v28 = vrot.slane %v977_v20, 2  ;;  %v990_v2 = vadd.f32 %v989_v15, %v988_v23 }
 0x270   :  { %v936_v44 = vrot.slane %v935_v12, 1  ;;  %v948_v58 = vadd.f32 %v947_v19, %v946_v33  ;;  %v979_v60 = vadd.f32 %v978_v28, %v977_v20  ;;  %v991_v55 = vrot.slane %v990_v2, 2 }
 0x271   :  { %1350 = vperm.xlu1 %2538, %v3472_v45  }
 0x272   :  { %v937_v54 = vadd.f32 %v936_v44, %v935_v12  ;;  %v949_v17 = vrot.slane %v948_v58, 1  ;;  %v980_v18 = vrot.slane %v979_v60, 1  ;;  %v992_v56 = vadd.f32 %v991_v55, %v990_v2 }
 0x274   :  { %v950_v6 = vadd.f32 %v949_v17, %v948_v58  ;;  %v3574_v27 = vmul.f32 0.015625, %v937_v54  ;;  %v981_v37 = vadd.f32 %v980_v18, %v979_v60  ;;  %v993_v61 = vrot.slane %v992_v56, 1 }
 0x275   :  { %1358 = vperm.xlu1 %2538, %v3504_v38  }
 0x276   :  { %v952_v59 = vmul.f32 0.015625, %v950_v6  ;;  %v994_v53 = vadd.f32 %v993_v61, %v992_v56  ;;  %v995_v16 = vmul.f32 0.015625, %v981_v37  ;;  %v997_v25 = vmul.f32 %v3574_v27, %v3574_v27 }
 0x277   :  { %v1017_v60 = vsub.f32 %v3561_v22, %v3574_v27  ;;  %v1015_v18 = vsub.f32 %v3548_v49, %v3574_v27 }
 0x278   :  { %v996_v23 = vmul.f32 0.015625, %v994_v53  ;;  %v998_v46 = vmul.f32 %v952_v59, %v952_v59  ;;  %v999_v33 = vsub.f32 %v995_v16, %v997_v25  ;;  %v1018_v44 = vsub.f32 %v924_v43, %v952_v59 }
 0x279   :  { %v1016_v54 = vsub.f32 %v3555_v11, %v952_v59  ;;  %v1014_v6 = vsub.f32 %v3536_v32, %v952_v59  ;;  %v1013_v43 = vsub.f32 %v3527_v48, %v3574_v27  ;;  %v1012_v22 = vsub.f32 %v3517_v41, %v952_v59 }
 0x27a   :  { %v1000_v20 = vsub.f32 %v996_v23, %v998_v46  ;;  %v1001_v15 = vmax.f32 %v999_v33, 0.0  ;;  %v1011_v11 = vsub.f32 %v3513_v36, %v3574_v27  ;;  %v1010_v16 = vsub.f32 %v3492_v52, %v952_v59 }
 0x27b   :  { %v1009_v25 = vsub.f32 %v3487_v7, %v3574_v27  ;;  %v1008_v23 = vsub.f32 %v3478_v5, %v952_v59  ;;  %v1007_v46 = vsub.f32 %v3476_v3, %v3574_v27  ;;  %v1006_v33 = vsub.f32 %v3463_v0, %v952_v59  ;;  %v2380_v0 = vld [vmem:[%s4315_s2 + $0x40] sm:$0xff] }
 0x27c   :  { %v1002_v12 = vmax.f32 %v1000_v20, 0.0  ;;  %v1019_v19 = vadd.f32 1e-05, %v1001_v15  ;;  %v1005_v20 = vsub.f32 %v3461_v34, %v3574_v27  ;;  %v1004_v15 = vsub.f32 %v3465_v13, %v952_v59  ;;  %v2381_v13 = vld [vmem:[%s4315_s2 + $0x48] sm:$0xff]  ;;  %v2384_v59 = vld [vmem:[%s4315_s2 + $0x60] sm:$0xff] }
 0x27d   :  { %v4323_v34 = vmov 0.0  }
 0x27e   :  { %v1020_v28 = vadd.f32 1e-05, %v1002_v12  ;;  %2624 = vrsqrt.f32 %v1019_v19  ;;  %v1003_v12 = vsub.f32 %v3456_v30, %v3574_v27  ;;  %v2382_v30 = vld [vmem:[%s4315_s2 + $0x50] sm:$0xff]  ;;  %v2383_v27 = vld [vmem:[%s4315_s2 + $0x58] sm:$0xff] }
 0x280   :  { %2626 = vrsqrt.f32 %v1020_v28  ;;  %v2385_v28 = vld [vmem:[%s4315_s2 + $0x68] sm:$0xff] }
 0x28b   :  { %v2625_v2 = vpop.eup %2624 }
 0x28c   :  { %v1037_v17 = vmul.f32 %v2625_v2, %v1017_v60  ;;  %v1035_v37 = vmul.f32 %v2625_v2, %v1015_v18  ;;  %v1033_v53 = vmul.f32 %v2625_v2, %v1013_v43  ;;  %v1031_v32 = vmul.f32 %v2625_v2, %v1011_v11 }
 0x28d   :  { %v2627_v58 = vpop.eup %2626  ;;  %v1029_v41 = vmul.f32 %v2625_v2, %v1009_v25  ;;  %v1027_v52 = vmul.f32 %v2625_v2, %v1007_v46  ;;  %v1025_v5 = vmul.f32 %v2625_v2, %v1005_v20  ;;  %v1023_v19 = vmul.f32 %v2625_v2, %v1003_v12  ;;  %v2386_v2 = vld [vmem:[%s4315_s2 + $0x70] sm:$0xff] }
 0x28e   :  { %v1038_v55 = vmul.f32 %v2627_v58, %v1018_v44  ;;  %v1036_v56 = vmul.f32 %v2627_v58, %v1016_v54  ;;  %v1034_v61 = vmul.f32 %v2627_v58, %v1014_v6  ;;  %v1032_v49 = vmul.f32 %v2627_v58, %v1012_v22  ;;  %v2387_v44 = vld [vmem:[%s4315_s2 + $0x78] sm:$0xff] }
 0x28f   :  { %v1030_v48 = vmul.f32 %v2627_v58, %v1010_v16  ;;  %v1028_v36 = vmul.f32 %v2627_v58, %v1008_v23  ;;  %v1026_v7 = vmul.f32 %v2627_v58, %v1006_v33  ;;  %v1024_v3 = vmul.f32 %v2627_v58, %v1004_v15  ;;  %v1050_v58 = vpop.permute.xlu1 %1049 }
 0x290   :  { %1120 = vmatprep.subr.mxu1 %v1038_v55 }
 0x291   :  { %1121 = vmatpush1.msra.mxu1 %v1037_v17  ;;  %v1054_v17 = vpop.permute.xlu0 %1053 }
 0x292   :  { %1122 = vmatprep.subr.mxu1 %v1036_v56 }
 0x293   :  { %1123 = vmatpush1.msra.mxu1 %v1035_v37  ;;  %v1058_v60 = vpop.permute.xlu1 %1057 }
 0x294   :  { %1124 = vmatprep.subr.mxu1 %v1034_v61 }
 0x295   :  { %1125 = vmatpush1.msra.mxu1 %v1033_v53  ;;  %v1235_v56 = vpop.permute.xlu0 %1234 }
 0x296   :  { %1126 = vmatprep.subr.mxu1 %v1032_v49 }
 0x297   :  { %1127 = vmatpush1.msra.mxu1 %v1031_v32 }
 0x298   :  { %1128 = vmatprep.subr.mxu1 %v1030_v48 }
 0x299   :  { %1129 = vmatpush1.msra.mxu1 %v1029_v41  ;;  %v1243_v16 = vpop.permute.xlu0 %1242 }
 0x29a   :  { %1130 = vmatprep.subr.mxu1 %v1028_v36 }
 0x29b   :  { %1131 = vmatpush1.msra.mxu1 %v1027_v52 }
 0x29c   :  { %1132 = vmatprep.subr.mxu1 %v1026_v7 }
 0x29d   :  { %1133 = vmatpush1.msra.mxu1 %v1025_v5 }
 0x29e   :  { %1134 = vmatprep.subr.mxu1 %v1024_v3 }
 0x29f   :  { %1135 = vmatpush1.msra.mxu1 %v1023_v19 }
 0x2a0   :  { %2388 = vmatmul.mubr.msk.f32.vlgmr.msra.gmra.mxu1 %vm643_vm1, %v2380_v0 }
 0x2a1   :  { %1174 = vmatprep.mubr.f32.mxu1 %v4323_v34 }
 0x2a4   :  { %2389 = vmatmul.mubr.msk.f32.gmra.mxu1 %vm643_vm1, %v2381_v13 }
 0x2a5   :  { %1180 = vmatprep.mubr.f32.mxu1 %v4323_v34 }
 0x2a8   :  { %2390 = vmatmul.mubr.msk.f32.gmra.mxu1 %vm643_vm1, %v2382_v30 }
 0x2a9   :  { %1186 = vmatprep.mubr.f32.mxu1 %v4323_v34 }
 0x2ac   :  { %2391 = vmatmul.mubr.msk.f32.gmra.mxu1 %vm643_vm1, %v2383_v27 }
 0x2ad   :  { %1192 = vmatprep.mubr.f32.mxu1 %v4323_v34 }
 0x2b0   :  { %2392 = vmatmul.mubr.msk.f32.gmra.mxu1 %vm643_vm1, %v2384_v59 }
 0x2b1   :  { %1198 = vmatprep.mubr.f32.mxu1 %v4323_v34 }
 0x2b4   :  { %2393 = vmatmul.mubr.msk.f32.gmra.mxu1 %vm643_vm1, %v2385_v28 }
 0x2b5   :  { %1204 = vmatprep.mubr.f32.mxu1 %v4323_v34 }
 0x2b8   :  { %2394 = vmatmul.mubr.msk.f32.gmra.mxu1 %vm643_vm1, %v2386_v2 }
 0x2b9   :  { %1210 = vmatprep.mubr.f32.mxu1 %v4323_v34 }
 0x2bc   :  { %2395 = vmatmul.mubr.msk.f32.gmra.mxu1 %vm643_vm1, %v2387_v44 }
 0x2bd   :  { %1620 = vmatprep.mubr.f32.mxu1 %v4323_v34 }
 0x2be   :  { %v1062_v55 = vpop.permute.xlu1 %1061  ;;  %v1247_v15 = vpop.permute.xlu0 %1246 }
 0x2c4   :  { %v1239_v54 = vpop.permute.xlu1 %1238 }
 0x2ca   :  { %v1066_v18 = vpop.permute.xlu1 %1065 }
 0x2ce   :  { %v1070_v22 = vpop.permute.xlu1 %1069 }
 0x2d2   :  { %v3657_v33 = vpop.permute.xlu1 %1073 }
 0x2d6   :  { %v3683_v13 = vpop.permute.xlu1 %1077 }
 0x360   :  { %v1170_v6 = vpop.f32.mrf.mxu1 }
 0x361   :  { %v1171_v37 = vadd.f32 %v1170_v6, %v1050_v58 }
 0x362   :  { %v1172_v43 = vpop.f32.mrf.mxu1 }
 0x363   :  { %v1173_v61 = vadd.f32 %v1172_v43, %v1050_v58  ;;  %v3643_v53 = vadd.f32 %v1171_v37, %v3063_v62 }
 0x364   :  { %v1176_v11 = vpop.f32.mrf.mxu1 }
 0x365   :  { %v1177_v49 = vadd.f32 %v1176_v11, %v1054_v17  ;;  %v3646_v25 = vadd.f32 %v1173_v61, %v3065_v1  ;;  %v3652_v41 = vmul.f32 %v1235_v56, %v3643_v53 }
 0x366   :  { %v1178_v32 = vpop.f32.mrf.mxu1 }
 0x367   :  { %v3649_v48 = vadd.f32 %v1177_v49, %v3069_v4  ;;  %v1179_v23 = vadd.f32 %v1178_v32, %v1054_v17  ;;  %v3663_v1 = vmul.f32 %v1235_v56, %v3646_v25  ;;  %2628 = vtanh.f32 %v3652_v41  ;;  %v1259_v56 = vpop.permute.xlu1 %1258 }
 0x368   :  { %v1182_v46 = vpop.f32.mrf.mxu1 }
 0x369   :  { %v3655_v36 = vadd.f32 %v1179_v23, %v3077_v8  ;;  %v1183_v62 = vadd.f32 %v1182_v46, %v1058_v60  ;;  %v3660_v52 = vmul.f32 %v1239_v54, %v3649_v48 }
 0x36a   :  { %v1184_v20 = vpop.f32.mrf.mxu1 }
 0x36b   :  { %v3666_v4 = vadd.f32 %v1183_v62, %v3086_v14  ;;  %v1185_v7 = vadd.f32 %v1184_v20, %v1058_v60  ;;  %v3670_v8 = vmul.f32 %v1239_v54, %v3655_v36  ;;  %2630 = vtanh.f32 %v3660_v52  ;;  %v1331_v62 = vpop.permute.xlu1 %1330 }
 0x36c   :  { %v1188_v5 = vpop.f32.mrf.mxu1  ;;  %2632 = vtanh.f32 %v3663_v1  ;;  %v2780_v54 = vmov 9  }
 0x36d   :  { %v3673_v12 = vmul.f32 %v1243_v16, %v3666_v4  ;;  %v3676_v3 = vadd.f32 %v1185_v7, %v3093_v21  ;;  %v1189_v19 = vadd.f32 %v1188_v5, %v1062_v55  ;;  %2541 = vset.pattern.permute.xlu1 %v2780_v54  ;;  %2540 = vset.pattern.permute.xlu0 %v2780_v54 }
 0x36e   :  { %v1190_v0 = vpop.f32.mrf.mxu1  ;;  %1505 = vperm.xlu1 %2541, %v3428_v51   ;;  %1501 = vperm.xlu0 %2540, %v3399_v26  }
 0x36f   :  { %v3681_v14 = vadd.f32 %v1189_v19, %v3100_v24  ;;  %v1191_v30 = vadd.f32 %v1190_v0, %v1062_v55  ;;  %2634 = vtanh.f32 %v3673_v12  ;;  %v3687_v27 = vmul.f32 %v1243_v16, %v3676_v3  ;;  %v1251_v24 = vpop.permute.xlu0 %1250 }
 0x370   :  { %v1194_v59 = vpop.f32.mrf.mxu1  ;;  %2636 = vtanh.f32 %v3670_v8  ;;  %v2781_v16 = vmov 11  }
 0x371   :  { %v3691_v21 = vmul.f32 %v1247_v15, %v3681_v14  ;;  %v3694_v28 = vadd.f32 %v1191_v30, %v3108_v29  ;;  %v1195_v2 = vadd.f32 %v1194_v59, %v1066_v18 }
 0x372   :  { %v1196_v44 = vpop.f32.mrf.mxu1  ;;  %1509 = vperm.xlu1 %2541, %v3392_v63   ;;  %2542 = vset.pattern.permute.xlu0 %v2781_v16 }
 0x373   :  { %2638 = vtanh.f32 %v3691_v21  ;;  %v3698_v58 = vmul.f32 %v1247_v15, %v3694_v28  ;;  %v3701_v60 = vadd.f32 %v1195_v2, %v3115_v35  ;;  %v1197_v55 = vadd.f32 %v1196_v44, %v1066_v18  ;;  %v1255_v61 = vpop.permute.xlu0 %1254  ;;  %1670 = vperm.xlu0 %2542, %v3399_v26  }
 0x374   :  { %2640 = vtanh.f32 %v3687_v27  ;;  %v1200_v17 = vpop.f32.mrf.mxu1 }
 0x375   :  { %v3707_v29 = vmul.f32 %v1251_v24, %v3701_v60  ;;  %v3710_v6 = vadd.f32 %v1197_v55, %v3122_v39  ;;  %v1201_v35 = vadd.f32 %v1200_v17, %v1070_v22  ;;  %2642 = vtanh.f32 %v3698_v58  ;;  %v2629_v39 = vpop.eup %2628 }
 0x376   :  { %v1202_v18 = vpop.f32.mrf.mxu1  ;;  %2543 = vset.pattern.permute.xlu1 %v2781_v16 }
 0x377   :  { %2644 = vtanh.f32 %v3707_v29  ;;  %v3715_v37 = vmul.f32 %v1251_v24, %v3710_v6  ;;  %v3718_v43 = vadd.f32 %v1201_v35, %v3131_v42  ;;  %v1203_v11 = vadd.f32 %v1202_v18, %v1070_v22  ;;  %1674 = vperm.xlu1 %2543, %v3428_v51   ;;  %1678 = vperm.xlu0 %2542, %v3392_v63   ;;  %v1263_v2 = vpop.permute.xlu0 %1262  ;;  %v1339_v18 = vpop.permute.xlu1 %1338 }
 0x378   :  { %v1206_v49 = vpop.f32.mrf.mxu1  ;;  %v2631_v46 = vpop.eup %2630  ;;  %v1297_v24 = vadd.f32 1.0, %v2629_v39 }
 0x379   :  { %2646 = vtanh.f32 %v3715_v37  ;;  %v3724_v32 = vmul.f32 %v1255_v61, %v3718_v43  ;;  %v1207_v23 = vadd.f32 %v1206_v49, %v3657_v33  ;;  %v3729_v42 = vadd.f32 %v1203_v11, %v3140_v50  ;;  %v2633_v15 = vpop.eup %2632 }
 0x37a   :  { %v1208_v22 = vpop.f32.mrf.mxu1  ;;  %v1298_v44 = vadd.f32 1.0, %v2633_v15 }
 0x37b   :  { %2648 = vtanh.f32 %v3724_v32  ;;  %v3733_v20 = vadd.f32 %v1207_v23, %v3149_v57  ;;  %v1209_v7 = vadd.f32 %v1208_v22, %v3657_v33  ;;  %v3737_v5 = vmul.f32 %v1255_v61, %v3729_v42  ;;  %2544 = vset.pattern.permute.xlu1 %v2780_v54  ;;  %1682 = vperm.xlu0 %2542, %v3412_v9  }
 0x37c   :  { %v1212_v19 = vpop.f32.mrf.mxu1  ;;  %v2635_v0 = vpop.eup %2634  ;;  %v1299_v33 = vadd.f32 1.0, %v2631_v46  ;;  %1513 = vperm.xlu1 %2544, %v3412_v9   ;;  %v1314_v22 = vmul.f32 %v1298_v44, %v3663_v1 }
 0x37d   :  { %v3741_v50 = vmul.f32 %v1259_v56, %v3733_v20  ;;  %v3744_v30 = vadd.f32 %v1209_v7, %v3156_v10  ;;  %v2637_v57 = vpop.eup %2636  ;;  %2650 = vtanh.f32 %v3737_v5  ;;  %v1213_v59 = vadd.f32 %v1212_v19, %v3683_v13  ;;  %v1335_v46 = vpop.permute.xlu0 %1334 }
 0x37e   :  { %v1301_v17 = vadd.f32 1.0, %v2635_v0  ;;  %v1300_v61 = vadd.f32 1.0, %v2637_v57  ;;  %v1214_v11 = vpop.f32.mrf.mxu1  ;;  %v1315_v49 = vmul.f32 %v1299_v33, %v3660_v52  ;;  %v4324_v33 = vld [vmem:[#allocation6_spill] sm:$0xff] }
 0x37f   :  { %2652 = vtanh.f32 %v3741_v50  ;;  %v3752_v55 = vmul.f32 %v1259_v56, %v3744_v30  ;;  %v3755_v35 = vadd.f32 %v1213_v59, %v3166_v31  ;;  %v1313_v31 = vmul.f32 %v1297_v24, %v3652_v41  ;;  %1686 = vperm.xlu0 %2542, %v3450_v40  }
 0x380   :  { %v2639_v10 = vpop.eup %2638  ;;  %v1317_v15 = vmul.f32 %v1301_v17, %v3673_v12  ;;  %v1215_v54 = vadd.f32 %v1214_v11, %v3683_v13  ;;  %v1316_v19 = vmul.f32 %v1300_v61, %v3670_v8  ;;  %v3771_v57 = vmul.f32 %v1335_v46, %v1315_v49  ;;  %1517 = vperm.xlu1 %2544, %v3450_v40   ;;  %v1343_v13 = vpop.permute.xlu1 %1342 }
 0x381   :  { %v2641_v63 = vpop.eup %2640  ;;  %2654 = vtanh.f32 %v3752_v55  ;;  %v3761_v39 = vmul.f32 %v1263_v2, %v3755_v35  ;;  %v1303_v56 = vadd.f32 1.0, %v2639_v10  ;;  %v3778_v12 = vmul.f32 %v1331_v62, %v1313_v31 }
 0x382   :  { %v2643_v23 = vpop.eup %2642  ;;  %v1302_v52 = vadd.f32 1.0, %v2641_v63  ;;  %v3775_v1 = vadd.f32 %v1215_v54, %v4324_v33  ;;  %v3780_v24 = vmul.f32 %v1331_v62, %v1314_v22  ;;  %v3782_v10 = vmul.f32 %v1339_v18, %v1317_v15 }
 0x383   :  { %2656 = vtanh.f32 %v3761_v39  ;;  %v1319_v41 = vmul.f32 %v1303_v56, %v3691_v21  ;;  %v1304_v44 = vadd.f32 1.0, %v2643_v23  ;;  %v3789_v61 = vmul.f32 %v1335_v46, %v1316_v19  ;;  %1690 = vperm.xlu0 %2542, %v3472_v45   ;;  %v1347_v23 = vpop.permute.xlu0 %1346 }
 0x384   :  { %v2645_v7 = vpop.eup %2644  ;;  %v3785_v17 = vmul.f32 %v1263_v2, %v3775_v1  ;;  %v1318_v63 = vmul.f32 %v1302_v52, %v3687_v27  ;;  %v1407_v62 = vmul.f32 %v3771_v57, %v3771_v57  ;;  %1521 = vperm.xlu1 %2544, %v3472_v45   ;;  %v1405_v27 = vmul.f32 %v3778_v12, %v3778_v12 }
 0x385   :  { %v1305_v59 = vadd.f32 1.0, %v2645_v7  ;;  %v3794_v56 = vmul.f32 %v1343_v13, %v1319_v41  ;;  %v1320_v31 = vmul.f32 %v1304_v44, %v3698_v58  ;;  %v1409_v7 = vmul.f32 %v3782_v10, %v3782_v10  ;;  %v1351_v41 = vpop.permute.xlu1 %1350 }
 0x386   :  { %v2647_v0 = vpop.eup %2646  ;;  %2658 = vtanh.f32 %v3785_v17  ;;  %v1377_v15 = vadd.f32 %v3771_v57, %v3778_v12  ;;  %v3810_v19 = vmul.f32 %v1339_v18, %v1318_v63 }
 0x387   :  { %v1321_v21 = vmul.f32 %v1305_v59, %v3707_v29  ;;  %v1306_v49 = vadd.f32 1.0, %v2647_v0  ;;  %v1406_v29 = vmul.f32 %v3780_v24, %v3780_v24  ;;  %v1408_v0 = vmul.f32 %v3789_v61, %v3789_v61  ;;  %1694 = vperm.xlu0 %2542, %v3498_v47  }
 0x388   :  { %v2649_v8 = vpop.eup %2648  ;;  %v1421_v59 = vadd.f32 %v1407_v62, %v1405_v27  ;;  %v1378_v44 = vadd.f32 %v1377_v15, %v3782_v10  ;;  %1525 = vperm.xlu1 %2544, %v3498_v47   ;;  %v3822_v18 = vmul.f32 %v1343_v13, %v1320_v31  ;;  %v1410_v13 = vmul.f32 %v3810_v19, %v3810_v19 }
 0x389   :  { %v1307_v11 = vadd.f32 1.0, %v2649_v8  ;;  %v3808_v52 = vmul.f32 %v1347_v23, %v1321_v21  ;;  %v1322_v58 = vmul.f32 %v1306_v49, %v3715_v37  ;;  %v1411_v8 = vmul.f32 %v3794_v56, %v3794_v56 }
 0x38a   :  { %v2651_v2 = vpop.eup %2650  ;;  %v1390_v49 = vadd.f32 %v3789_v61, %v3780_v24  ;;  %v1379_v62 = vadd.f32 %v1378_v44, %v3794_v56 }
 0x38b   :  { %v1323_v22 = vmul.f32 %v1307_v11, %v3724_v32  ;;  %v1308_v54 = vadd.f32 1.0, %v2651_v2  ;;  %v1422_v2 = vadd.f32 %v1421_v59, %v1409_v7  ;;  %v1413_v27 = vmul.f32 %v3808_v52, %v3808_v52 }
 0x38c   :  { %v2653_v46 = vpop.eup %2652  ;;  %v3833_v31 = vmul.f32 %v1347_v23, %v1322_v58  ;;  %1529 = vperm.xlu1 %2544, %v3504_v38   ;;  %v1434_v59 = vadd.f32 %v1408_v0, %v1406_v29  ;;  %v1391_v23 = vadd.f32 %v1390_v49, %v3810_v19 }
 0x38d   :  { %v1309_v33 = vadd.f32 1.0, %v2653_v46  ;;  %v3819_v21 = vmul.f32 %v1351_v41, %v1323_v22  ;;  %v1324_v63 = vmul.f32 %v1308_v54, %v3737_v5  ;;  %v1355_v22 = vpop.permute.xlu0 %1354  ;;  %v1423_v54 = vadd.f32 %v1422_v2, %v1411_v8 }
 0x38e   :  { %v2655_v32 = vpop.eup %2654  ;;  %v1435_v2 = vadd.f32 %v1434_v59, %v1410_v13  ;;  %v1414_v29 = vmul.f32 %v3833_v31, %v3833_v31 }
 0x38f   :  { %v1310_v11 = vadd.f32 1.0, %v2655_v32  ;;  %v1325_v37 = vmul.f32 %v1309_v33, %v3741_v50  ;;  %v2782_v50 = vmov 10   ;;  %v1415_v7 = vmul.f32 %v3819_v21, %v3819_v21 }
 0x390   :  { %v2657_v46 = vpop.eup %2656  ;;  %2546 = vset.pattern.permute.xlu0 %v2782_v50  ;;  %v1380_v32 = vadd.f32 %v1379_v62, %v3808_v52  ;;  %v3846_v58 = vmul.f32 %v1351_v41, %v1324_v63  ;;  %v1424_v8 = vadd.f32 %v1423_v54, %v1413_v27  ;;  %v1392_v62 = vadd.f32 %v1391_v23, %v3822_v18 }
 0x391   :  { %v1326_v5 = vmul.f32 %v1310_v11, %v3752_v55  ;;  %v3836_v15 = vmul.f32 %v1355_v22, %v1325_v37  ;;  %v1311_v33 = vadd.f32 1.0, %v2657_v46  ;;  %1766 = vperm.xlu0 %2546, %v3399_v26   ;;  %v1412_v55 = vmul.f32 %v3822_v18, %v3822_v18  ;;  %v1359_v26 = vpop.permute.xlu1 %1358  ;;  %2545 = vset.pattern.permute.xlu1 %v2781_v16 }
 0x392   :  { %v1381_v11 = vadd.f32 %v1380_v32, %v3819_v21  ;;  %v1416_v46 = vmul.f32 %v3846_v58, %v3846_v58  ;;  %v1393_v13 = vadd.f32 %v1392_v62, %v3833_v31  ;;  %1698 = vperm.xlu1 %2545, %v3504_v38  }
 0x393   :  { %v1327_v44 = vmul.f32 %v1311_v33, %v3761_v39  ;;  %v1417_v37 = vmul.f32 %v3836_v15, %v3836_v15  ;;  %v3855_v0 = vmul.f32 %v1355_v22, %v1326_v5  ;;  %v1425_v39 = vadd.f32 %v1424_v8, %v1415_v7  ;;  %v2659_v63 = vpop.eup %2658 }
 0x394   :  { %v1382_v41 = vadd.f32 %v1381_v11, %v3836_v15  ;;  %v1436_v27 = vadd.f32 %v1435_v2, %v1412_v55  ;;  %v1312_v22 = vadd.f32 1.0, %v2659_v63  ;;  %v1394_v59 = vadd.f32 %v1393_v13, %v3846_v58 }
 0x395   :  { %v3857_v49 = vmul.f32 %v1359_v26, %v1327_v44  ;;  %1778 = vperm.xlu0 %2546, %v3412_v9   ;;  %v1426_v7 = vadd.f32 %v1425_v39, %v1417_v37  ;;  %v1418_v9 = vmul.f32 %v3855_v0, %v3855_v0 }
 0x396   :  { %v1437_v33 = vadd.f32 %v1436_v27, %v1414_v29  ;;  %v1328_v16 = vmul.f32 %v1312_v22, %v3785_v17  ;;  %2547 = vset.pattern.permute.xlu1 %v2782_v50  ;;  %v1395_v11 = vadd.f32 %v1394_v59, %v3855_v0  ;;  %v3880_v50 = vld [vmem:[%s4316_s3 + $0x10] sm:$0xff] }
 0x397   :  { %v1419_v5 = vmul.f32 %v3857_v49, %v3857_v49  ;;  %v1383_v54 = vadd.f32 %v1382_v41, %v3857_v49  ;;  %1770 = vperm.xlu1 %2547, %v3428_v51  }
 0x398   :  { %v1438_v55 = vadd.f32 %v1437_v33, %v1416_v46  ;;  %v1376_v44 = vmul.f32 %v1359_v26, %v1328_v16 }
 0x399   :  { %v1384_v32 = vrot.slane %v1383_v54, 4  ;;  %v1427_v23 = vadd.f32 %v1426_v7, %v1419_v5  ;;  %1786 = vperm.xlu0 %2546, %v3472_v45  }
 0x39a   :  { %v1439_v37 = vadd.f32 %v1438_v55, %v1418_v9  ;;  %v1420_v2 = vmul.f32 %v1376_v44, %v1376_v44  ;;  %v1396_v41 = vadd.f32 %v1395_v11, %v1376_v44 }
 0x39b   :  { %v1385_v8 = vadd.f32 %v1384_v32, %v1383_v54  ;;  %v1428_v62 = vrot.slane %v1427_v23, 4  ;;  %1774 = vperm.xlu1 %2547, %v3880_v50  }
 0x39c   :  { %v1397_v63 = vrot.slane %v1396_v41, 4  ;;  %v1440_v45 = vadd.f32 %v1439_v37, %v1420_v2 }
 0x39d   :  { %v1386_v29 = vrot.slane %v1385_v8, 2  ;;  %v1429_v17 = vadd.f32 %v1428_v62, %v1427_v23  ;;  %1794 = vperm.xlu0 %2546, %v3504_v38  }
 0x39e   :  { %v1398_v51 = vadd.f32 %v1397_v63, %v1396_v41  ;;  %v1441_v13 = vrot.slane %v1440_v45, 4 }
 0x39f   :  { %v1387_v39 = vadd.f32 %v1386_v29, %v1385_v8  ;;  %v1430_v27 = vrot.slane %v1429_v17, 2  ;;  %1782 = vperm.xlu1 %2547, %v3450_v40  }
 0x3a0   :  { %v1399_v5 = vrot.slane %v1398_v51, 2  ;;  %v1442_v7 = vadd.f32 %v1441_v13, %v1440_v45 }
 0x3a1   :  { %v1388_v26 = vrot.slane %v1387_v39, 1  ;;  %v1431_v46 = vadd.f32 %v1430_v27, %v1429_v17 }
 0x3a2   :  { %v1400_v38 = vadd.f32 %v1399_v5, %v1398_v51  ;;  %v1443_v16 = vrot.slane %v1442_v7, 2 }
 0x3a3   :  { %v1389_v22 = vadd.f32 %v1388_v26, %v1387_v39  ;;  %v1432_v54 = vrot.slane %v1431_v46, 1  ;;  %1790 = vperm.xlu1 %2547, %v3498_v47  }
 0x3a4   :  { %v1401_v32 = vrot.slane %v1400_v38, 1  ;;  %v1444_v59 = vadd.f32 %v1443_v16, %v1442_v7 }
 0x3a5   :  { %v3884_v33 = vmul.f32 0.015625, %v1389_v22  ;;  %v1433_v9 = vadd.f32 %v1432_v54, %v1431_v46 }
 0x3a6   :  { %v1402_v8 = vadd.f32 %v1401_v32, %v1400_v38  ;;  %v1445_v11 = vrot.slane %v1444_v59, 1 }
 0x3a7   :  { %v1447_v23 = vmul.f32 0.015625, %v1433_v9  ;;  %v1449_v55 = vmul.f32 %v3884_v33, %v3884_v33  ;;  %v1469_v47 = vsub.f32 %v3857_v49, %v3884_v33  ;;  %v1467_v22 = vsub.f32 %v3836_v15, %v3884_v33 }
 0x3a8   :  { %v1404_v37 = vmul.f32 0.015625, %v1402_v8  ;;  %v1446_v2 = vadd.f32 %v1445_v11, %v1444_v59  ;;  %v1461_v59 = vsub.f32 %v3794_v56, %v3884_v33  ;;  %v1457_v11 = vsub.f32 %v3771_v57, %v3884_v33  ;;  %v2397_v57 = vld [vmem:[%s4315_s2 + $0x88] sm:$0xff] }
 0x3a9   :  { %v1451_v62 = vsub.f32 %v1447_v23, %v1449_v55  ;;  %v1459_v55 = vsub.f32 %v3782_v10, %v3884_v33 }
 0x3aa   :  { %v1448_v40 = vmul.f32 0.015625, %v1446_v2  ;;  %v1450_v41 = vmul.f32 %v1404_v37, %v1404_v37  ;;  %v1470_v26 = vsub.f32 %v1376_v44, %v1404_v37  ;;  %v1468_v13 = vsub.f32 %v3855_v0, %v1404_v37 }
 0x3ab   :  { %v1453_v29 = vmax.f32 %v1451_v62, 0.0  ;;  %v1466_v7 = vsub.f32 %v3846_v58, %v1404_v37  ;;  %v1465_v44 = vsub.f32 %v3819_v21, %v3884_v33  ;;  %v1464_v49 = vsub.f32 %v3833_v31, %v1404_v37 }
 0x3ac   :  { %v1452_v17 = vsub.f32 %v1448_v40, %v1450_v41  ;;  %v1463_v0 = vsub.f32 %v3808_v52, %v3884_v33  ;;  %v1462_v32 = vsub.f32 %v3822_v18, %v1404_v37  ;;  %v1460_v23 = vsub.f32 %v3810_v19, %v1404_v37  ;;  %v2402_v40 = vld [vmem:[%s4315_s2 + $0xb0] sm:$0xff]  ;;  %v2403_v41 = vld [vmem:[%s4315_s2 + $0xb8] sm:$0xff] }
 0x3ad   :  { %v1471_v39 = vadd.f32 1e-05, %v1453_v29  ;;  %v1458_v8 = vsub.f32 %v3789_v61, %v1404_v37  ;;  %v1456_v62 = vsub.f32 %v3780_v24, %v1404_v37  ;;  %v1455_v2 = vsub.f32 %v3778_v12, %v3884_v33  ;;  %v2396_v61 = vld [vmem:[%s4315_s2 + $0x80] sm:$0xff]  ;;  %v2398_v12 = vld [vmem:[%s4315_s2 + $0x90] sm:$0xff]  ;;  %v2399_v24 = vld [vmem:[%s4315_s2 + $0x98] sm:$0xff] }
 0x3ae   :  { %v1454_v63 = vmax.f32 %v1452_v17, 0.0  ;;  %v2400_v33 = vld [vmem:[%s4315_s2 + $0xa0] sm:$0xff]  ;;  %v2401_v37 = vld [vmem:[%s4315_s2 + $0xa8] sm:$0xff] }
 0x3af   :  { %2660 = vrsqrt.f32 %v1471_v39 }
 0x3b0   :  { %v1472_v27 = vadd.f32 1e-05, %v1454_v63 }
 0x3b2   :  { %2662 = vrsqrt.f32 %v1472_v27 }
 0x3bc   :  { %v2661_v45 = vpop.eup %2660 }
 0x3bd   :  { %v1489_v5 = vmul.f32 %v2661_v45, %v1469_v47  ;;  %v1487_v38 = vmul.f32 %v2661_v45, %v1467_v22  ;;  %v1485_v16 = vmul.f32 %v2661_v45, %v1465_v44  ;;  %v1483_v58 = vmul.f32 %v2661_v45, %v1463_v0 }
 0x3be   :  { %v1481_v31 = vmul.f32 %v2661_v45, %v1461_v59  ;;  %v1479_v18 = vmul.f32 %v2661_v45, %v1459_v55  ;;  %v1477_v19 = vmul.f32 %v2661_v45, %v1457_v11  ;;  %v1475_v29 = vmul.f32 %v2661_v45, %v1455_v2  ;;  %v3989_v2 = vld [vmem:[%s4316_s3 + $0x18] sm:$0xff] }
 0x3bf   :  { %v2663_v51 = vpop.eup %2662  ;;  %v2784_v55 = vmov 13  }
 0x3c0   :  { %v1490_v46 = vmul.f32 %v2663_v51, %v1470_v26  ;;  %v1488_v54 = vmul.f32 %v2663_v51, %v1468_v13  ;;  %v1486_v9 = vmul.f32 %v2663_v51, %v1466_v7  ;;  %v1484_v15 = vmul.f32 %v2663_v51, %v1464_v49  ;;  %v3959_v49 = vld [vmem:[%s4316_s3] sm:$0xff] }
 0x3c1   :  { %v1482_v21 = vmul.f32 %v2663_v51, %v1462_v32  ;;  %v1480_v52 = vmul.f32 %v2663_v51, %v1460_v23  ;;  %v1478_v56 = vmul.f32 %v2663_v51, %v1458_v8  ;;  %v1476_v10 = vmul.f32 %v2663_v51, %v1456_v62 }
 0x3c2   :  { %1572 = vmatprep.subr.mxu1 %v1490_v46 }
 0x3c3   :  { %1573 = vmatpush1.msra.mxu1 %v1489_v5 }
 0x3c4   :  { %1574 = vmatprep.subr.mxu1 %v1488_v54 }
 0x3c5   :  { %1575 = vmatpush1.msra.mxu1 %v1487_v38  ;;  %v2783_v38 = vmov 12  }
 0x3c6   :  { %1576 = vmatprep.subr.mxu1 %v1486_v9  ;;  %2548 = vset.pattern.permute.xlu1 %v2783_v38 }
 0x3c7   :  { %1577 = vmatpush1.msra.mxu1 %v1485_v16  ;;  %2549 = vset.pattern.permute.xlu0 %v2783_v38  ;;  %v3965_v16 = vld [vmem:[%s4316_s3 + $0x8] sm:$0xff] }
 0x3c8   :  { %1578 = vmatprep.subr.mxu1 %v1484_v15  ;;  %1937 = vperm.xlu1 %2548, %v3959_v49  }
 0x3c9   :  { %1579 = vmatpush1.msra.mxu1 %v1483_v58  ;;  %1941 = vperm.xlu0 %2549, %v3965_v16  }
 0x3ca   :  { %1580 = vmatprep.subr.mxu1 %v1482_v21 }
 0x3cb   :  { %1581 = vmatpush1.msra.mxu1 %v1481_v31 }
 0x3cc   :  { %1582 = vmatprep.subr.mxu1 %v1480_v52  ;;  %1945 = vperm.xlu1 %2548, %v3880_v50  }
 0x3cd   :  { %1583 = vmatpush1.msra.mxu1 %v1479_v18  ;;  %2550 = vset.pattern.permute.xlu0 %v2784_v55 }
 0x3ce   :  { %1584 = vmatprep.subr.mxu1 %v1478_v56  ;;  %2122 = vperm.xlu0 %2550, %v3959_v49  }
 0x3cf   :  { %1585 = vmatpush1.msra.mxu1 %v1477_v19 }
 0x3d0   :  { %1586 = vmatprep.subr.mxu1 %v1476_v10  ;;  %1949 = vperm.xlu1 %2548, %v3989_v2  }
 0x3d1   :  { %1587 = vmatpush1.msra.mxu1 %v1475_v29 }
 0x3d2   :  { %2404 = vmatmul.mubr.msk.f32.vlgmr.msra.gmra.mxu1 %vm643_vm1, %v2396_v61  ;;  %2130 = vperm.xlu0 %2550, %v3880_v50  }
 0x3d3   :  { %1626 = vmatprep.mubr.f32.mxu1 %v4323_v34 }
 0x3d4   :  { %2551 = vset.pattern.permute.xlu1 %v2784_v55 }
 0x3d5   :  { %2126 = vperm.xlu1 %2551, %v3965_v16  }
 0x3d6   :  { %2405 = vmatmul.mubr.msk.f32.gmra.mxu1 %vm643_vm1, %v2397_v57  ;;  %2134 = vperm.xlu0 %2550, %v3989_v2  }
 0x3d7   :  { %1632 = vmatprep.mubr.f32.mxu1 %v4323_v34 }
 0x3d9   :  { %2552 = vset.pattern.permute.xlu1 %v2783_v38 }
 0x3da   :  { %2406 = vmatmul.mubr.msk.f32.gmra.mxu1 %vm643_vm1, %v2398_v12 }
 0x3db   :  { %1638 = vmatprep.mubr.f32.mxu1 %v4323_v34 }
 0x3de   :  { %2407 = vmatmul.mubr.msk.f32.gmra.mxu1 %vm643_vm1, %v2399_v24 }
 0x3df   :  { %1644 = vmatprep.mubr.f32.mxu1 %v4323_v34 }
 0x3e2   :  { %2408 = vmatmul.mubr.msk.f32.gmra.mxu1 %vm643_vm1, %v2400_v33 }
 0x3e3   :  { %1650 = vmatprep.mubr.f32.mxu1 %v4323_v34 }
 0x3e6   :  { %2409 = vmatmul.mubr.msk.f32.gmra.mxu1 %vm643_vm1, %v2401_v37 }
 0x3e7   :  { %1656 = vmatprep.mubr.f32.mxu1 %v4323_v34 }
 0x3e9   :  { %v1506_v17 = vpop.permute.xlu1 %1505  ;;  %v1502_v27 = vpop.permute.xlu0 %1501 }
 0x3ea   :  { %2410 = vmatmul.mubr.msk.f32.gmra.mxu1 %vm643_vm1, %v2402_v40 }
 0x3eb   :  { %1662 = vmatprep.mubr.f32.mxu1 %v4323_v34 }
 0x3ed   :  { %v1510_v39 = vpop.permute.xlu1 %1509 }
 0x3ee   :  { %2411 = vmatmul.mubr.msk.f32.gmra.mxu1 %vm643_vm1, %v2403_v41  ;;  %v1671_v26 = vpop.permute.xlu0 %1670 }
 0x3ef   :  { %2092 = vmatprep.mubr.f32.mxu1 %v4323_v34 }
 0x3f2   :  { %v1675_v63 = vpop.permute.xlu1 %1674  ;;  %v1679_v13 = vpop.permute.xlu0 %1678 }
 0x3f6   :  { %v1683_v59 = vpop.permute.xlu0 %1682 }
 0x3f7   :  { %v1514_v45 = vpop.permute.xlu1 %1513 }
 0x3fa   :  { %v1687_v10 = vpop.permute.xlu0 %1686 }
 0x3fb   :  { %v1518_v51 = vpop.permute.xlu1 %1517 }
 0x3ff   :  { %v3954_v44 = vpop.permute.xlu1 %1521 }
 0x403   :  { %v1526_v8 = vpop.permute.xlu1 %1525 }
 0x407   :  { %v3996_v24 = vpop.permute.xlu1 %1529 }
 0x492   :  { %v1622_v47 = vpop.f32.mrf.mxu1 }
 0x493   :  { %v1623_v46 = vadd.f32 %v1622_v47, %v1502_v27  ;;  %v1699_v47 = vpop.permute.xlu1 %1698 }
 0x494   :  { %v1624_v22 = vpop.f32.mrf.mxu1 }
 0x495   :  { %v1625_v5 = vadd.f32 %v1624_v22, %v1502_v27  ;;  %v3952_v54 = vmul.f32 %v1671_v26, %v1623_v46  ;;  %v4014_v22 = vld [vmem:[%s4316_s3 + $0x20] sm:$0xff] }
 0x496   :  { %v1628_v7 = vpop.f32.mrf.mxu1  ;;  %2138 = vperm.xlu0 %2550, %v4014_v22   ;;  %1953 = vperm.xlu1 %2552, %v4014_v22  }
 0x497   :  { %v1629_v9 = vadd.f32 %v1628_v7, %v1506_v17  ;;  %v3968_v0 = vmul.f32 %v1671_v26, %v1625_v5  ;;  %2664 = vtanh.f32 %v3952_v54 }
 0x498   :  { %v1630_v15 = vpop.f32.mrf.mxu1 }
 0x499   :  { %v3970_v32 = vmul.f32 %v1675_v63, %v1629_v9  ;;  %v1631_v58 = vadd.f32 %v1630_v15, %v1506_v17 }
 0x49a   :  { %v1634_v21 = vpop.f32.mrf.mxu1 }
 0x49b   :  { %2666 = vtanh.f32 %v3970_v32  ;;  %v3974_v23 = vmul.f32 %v1675_v63, %v1631_v58  ;;  %v1635_v31 = vadd.f32 %v1634_v21, %v1510_v39 }
 0x49c   :  { %2668 = vtanh.f32 %v3968_v0  ;;  %v1636_v52 = vpop.f32.mrf.mxu1 }
 0x49d   :  { %2670 = vtanh.f32 %v3974_v23  ;;  %v3981_v18 = vmul.f32 %v1679_v13, %v1635_v31  ;;  %v1637_v11 = vadd.f32 %v1636_v52, %v1510_v39  ;;  %v1691_v39 = vpop.permute.xlu0 %1690 }
 0x49e   :  { %v1640_v56 = vpop.f32.mrf.mxu1 }
 0x49f   :  { %2672 = vtanh.f32 %v3981_v18  ;;  %v3984_v62 = vmul.f32 %v1679_v13, %v1637_v11  ;;  %v1641_v19 = vadd.f32 %v1640_v56, %v1514_v45 }
 0x4a0   :  { %v1642_v29 = vpop.f32.mrf.mxu1 }
 0x4a1   :  { %2674 = vtanh.f32 %v3984_v62  ;;  %v3994_v61 = vmul.f32 %v1683_v59, %v1641_v19  ;;  %v1643_v57 = vadd.f32 %v1642_v29, %v1514_v45  ;;  %v1695_v31 = vpop.permute.xlu0 %1694  ;;  %v4028_v19 = vld [vmem:[%s4316_s3 + $0x28] sm:$0xff]  ;;  %v1771_v29 = vpop.permute.xlu1 %1770 }
 0x4a2   :  { %v1646_v12 = vpop.f32.mrf.mxu1  ;;  %2142 = vperm.xlu0 %2550, %v4028_v19   ;;  %1957 = vperm.xlu1 %2552, %v4028_v19  }
 0x4a3   :  { %2676 = vtanh.f32 %v3994_v61  ;;  %v3999_v33 = vmul.f32 %v1683_v59, %v1643_v57  ;;  %v1647_v37 = vadd.f32 %v1646_v12, %v1518_v51 }
 0x4a4   :  { %v1648_v40 = vpop.f32.mrf.mxu1  ;;  %v2665_v27 = vpop.eup %2664 }
 0x4a5   :  { %2678 = vtanh.f32 %v3999_v33  ;;  %v4005_v41 = vmul.f32 %v1687_v10, %v1647_v37  ;;  %v1649_v17 = vadd.f32 %v1648_v40, %v1518_v51  ;;  %v1733_v52 = vadd.f32 1.0, %v2665_v27 }
 0x4a6   :  { %v1652_v63 = vpop.f32.mrf.mxu1 }
 0x4a7   :  { %2680 = vtanh.f32 %v4005_v41  ;;  %v4008_v45 = vmul.f32 %v1687_v10, %v1649_v17  ;;  %v1653_v26 = vadd.f32 %v1652_v63, %v3954_v44 }
 0x4a8   :  { %v2667_v46 = vpop.eup %2666  ;;  %v1654_v13 = vpop.f32.mrf.mxu1 }
 0x4a9   :  { %v2669_v51 = vpop.eup %2668  ;;  %2682 = vtanh.f32 %v4008_v45  ;;  %v4018_v5 = vmul.f32 %v1691_v39, %v1653_v26  ;;  %v1655_v7 = vadd.f32 %v1654_v13, %v3954_v44  ;;  %v1735_v58 = vadd.f32 1.0, %v2667_v46 }
 0x4aa   :  { %v2671_v9 = vpop.eup %2670  ;;  %v1658_v15 = vpop.f32.mrf.mxu1  ;;  %v1734_v44 = vadd.f32 1.0, %v2669_v51  ;;  %v1749_v46 = vmul.f32 %v1733_v52, %v3952_v54  ;;  %v4045_v51 = vld [vmem:[%s4316_s3 + $0x38] sm:$0xff]  ;;  %v2747_v54 = vld [vmem:[%s4316_s3 + $0x30] sm:$0xff] }
 0x4ab   :  { %2684 = vtanh.f32 %v4018_v5  ;;  %v4023_v38 = vmul.f32 %v1691_v39, %v1655_v7  ;;  %v1659_v59 = vadd.f32 %v1658_v15, %v1526_v8  ;;  %v1736_v11 = vadd.f32 1.0, %v2671_v9  ;;  %2150 = vperm.xlu0 %2550, %v4045_v51   ;;  %1961 = vperm.xlu1 %2552, %v2747_v54  }
 0x4ac   :  { %v2673_v21 = vpop.eup %2672  ;;  %v1660_v56 = vpop.f32.mrf.mxu1  ;;  %v1751_v37 = vmul.f32 %v1735_v58, %v3970_v32  ;;  %v1750_v7 = vmul.f32 %v1734_v44, %v3968_v0 }
 0x4ad   :  { %2686 = vtanh.f32 %v4023_v38  ;;  %v4032_v10 = vmul.f32 %v1695_v31, %v1659_v59  ;;  %v1661_v57 = vadd.f32 %v1660_v56, %v1526_v8  ;;  %v1737_v17 = vadd.f32 1.0, %v2673_v21  ;;  %v1767_v32 = vpop.permute.xlu0 %1766  ;;  %v1775_v0 = vpop.permute.xlu1 %1774 }
 0x4ae   :  { %v2675_v12 = vpop.eup %2674  ;;  %v1664_v40 = vpop.f32.mrf.mxu1  ;;  %v1752_v13 = vmul.f32 %v1736_v11, %v3974_v23  ;;  %v4058_v21 = vmul.f32 %v1771_v29, %v1751_v37 }
 0x4af   :  { %2688 = vtanh.f32 %v4032_v10  ;;  %v4037_v39 = vmul.f32 %v1695_v31, %v1661_v57  ;;  %v1665_v63 = vadd.f32 %v1664_v40, %v3996_v24  ;;  %v1738_v27 = vadd.f32 1.0, %v2675_v12  ;;  %1965 = vperm.xlu1 %2552, %v4045_v51  }
 0x4b0   :  { %v2677_v26 = vpop.eup %2676  ;;  %v1666_v8 = vpop.f32.mrf.mxu1  ;;  %v1753_v58 = vmul.f32 %v1737_v17, %v3981_v18  ;;  %v4065_v56 = vmul.f32 %v1771_v29, %v1752_v13  ;;  %v2785_v57 = vmov 14   ;;  %v4067_v12 = vmul.f32 %v1767_v32, %v1750_v7 }
 0x4b1   :  { %2690 = vtanh.f32 %v4037_v39  ;;  %v4050_v9 = vmul.f32 %v1699_v47, %v1665_v63  ;;  %v1667_v15 = vadd.f32 %v1666_v8, %v3996_v24  ;;  %v1754_v59 = vmul.f32 %v1738_v27, %v3984_v62  ;;  %2555 = vset.pattern.permute.xlu0 %v2785_v57  ;;  %v1779_v29 = vpop.permute.xlu0 %1778 }
 0x4b2   :  { %v2679_v23 = vpop.eup %2678  ;;  %v1739_v52 = vadd.f32 1.0, %v2677_v26  ;;  %v4063_v24 = vmul.f32 %v1767_v32, %v1749_v46  ;;  %2190 = vperm.xlu0 %2555, %v3965_v16   ;;  %v1843_v63 = vmul.f32 %v4058_v21, %v4058_v21  ;;  %v1844_v16 = vmul.f32 %v4065_v56, %v4065_v56 }
 0x4b3   :  { %2692 = vtanh.f32 %v4050_v9  ;;  %v4061_v31 = vmul.f32 %v1699_v47, %v1667_v15  ;;  %v1740_v44 = vadd.f32 1.0, %v2679_v23  ;;  %v4073_v47 = vmul.f32 %v1775_v0, %v1753_v58  ;;  %2553 = vset.pattern.permute.xlu1 %v2784_v55 }
 0x4b4   :  { %v2681_v11 = vpop.eup %2680  ;;  %v1755_v18 = vmul.f32 %v1739_v52, %v3994_v61  ;;  %v4075_v37 = vmul.f32 %v1775_v0, %v1754_v59  ;;  %v1841_v61 = vmul.f32 %v4063_v24, %v4063_v24  ;;  %v1842_v8 = vmul.f32 %v4067_v12, %v4067_v12  ;;  %v1783_v0 = vpop.permute.xlu1 %1782  ;;  %2146 = vperm.xlu1 %2553, %v2747_v54  }
 0x4b5   :  { %2694 = vtanh.f32 %v4061_v31  ;;  %v1756_v40 = vmul.f32 %v1740_v44, %v3999_v33  ;;  %v1741_v17 = vadd.f32 1.0, %v2681_v11  ;;  %v1813_v23 = vadd.f32 %v4058_v21, %v4063_v24 }
 0x4b6   :  { %v2683_v62 = vpop.eup %2682  ;;  %v4084_v46 = vmul.f32 %v1779_v29, %v1755_v18  ;;  %2202 = vperm.xlu0 %2555, %v4014_v22   ;;  %v1826_v58 = vadd.f32 %v4065_v56, %v4067_v12  ;;  %v1846_v59 = vmul.f32 %v4075_v37, %v4075_v37  ;;  %v1870_v44 = vadd.f32 %v1844_v16, %v1842_v8 }
 0x4b7   :  { %v1742_v27 = vadd.f32 1.0, %v2683_v62  ;;  %v1757_v13 = vmul.f32 %v1741_v17, %v4005_v41  ;;  %v4089_v33 = vmul.f32 %v1779_v29, %v1756_v40  ;;  %v1845_v41 = vmul.f32 %v4073_v47, %v4073_v47  ;;  %v1787_v40 = vpop.permute.xlu0 %1786 }
 0x4b8   :  { %v2685_v26 = vpop.eup %2684  ;;  %v1814_v18 = vadd.f32 %v1813_v23, %v4073_v47  ;;  %v1847_v62 = vmul.f32 %v4084_v46, %v4084_v46  ;;  %v1827_v17 = vadd.f32 %v1826_v58, %v4075_v37  ;;  %v1871_v16 = vadd.f32 %v1870_v44, %v1846_v59  ;;  %2554 = vset.pattern.permute.xlu1 %v2785_v57 }
 0x4b9   :  { %v1758_v32 = vmul.f32 %v1742_v27, %v4008_v45  ;;  %v1743_v7 = vadd.f32 1.0, %v2685_v26  ;;  %v1857_v45 = vadd.f32 %v1843_v63, %v1841_v61  ;;  %v4102_v52 = vmul.f32 %v1783_v0, %v1757_v13  ;;  %2186 = vperm.xlu1 %2554, %v3959_v49  }
 0x4ba   :  { %v2687_v15 = vpop.eup %2686  ;;  %v1848_v63 = vmul.f32 %v4089_v33, %v4089_v33  ;;  %2210 = vperm.xlu0 %2555, %v2747_v54   ;;  %v1815_v8 = vadd.f32 %v1814_v18, %v4084_v46 }
 0x4bb   :  { %v1744_v55 = vadd.f32 1.0, %v2687_v15  ;;  %v1759_v22 = vmul.f32 %v1743_v7, %v4018_v5  ;;  %v4108_v29 = vmul.f32 %v1783_v0, %v1758_v32  ;;  %v1858_v61 = vadd.f32 %v1857_v45, %v1845_v41  ;;  %v1791_v45 = vpop.permute.xlu1 %1790 }
 0x4bc   :  { %v2689_v11 = vpop.eup %2688  ;;  %v1828_v32 = vadd.f32 %v1827_v17, %v4089_v33  ;;  %v1849_v7 = vmul.f32 %v4102_v52, %v4102_v52  ;;  %v1872_v57 = vadd.f32 %v1871_v16, %v1848_v63  ;;  %v1816_v59 = vadd.f32 %v1815_v8, %v4102_v52  ;;  %v1795_v16 = vpop.permute.xlu0 %1794 }
 0x4bd   :  { %v1760_v27 = vmul.f32 %v1744_v55, %v4023_v38  ;;  %v4114_v26 = vmul.f32 %v1787_v40, %v1759_v22  ;;  %v1745_v13 = vadd.f32 1.0, %v2689_v11  ;;  %v1859_v23 = vadd.f32 %v1858_v61, %v1847_v62  ;;  %2194 = vperm.xlu1 %2554, %v3880_v50  }
 0x4be   :  { %v2691_v5 = vpop.eup %2690  ;;  %v1850_v54 = vmul.f32 %v4108_v29, %v4108_v29  ;;  %v1829_v11 = vadd.f32 %v1828_v32, %v4108_v29 }
 0x4bf   :  { %v4120_v15 = vmul.f32 %v1787_v40, %v1760_v27  ;;  %v1746_v58 = vadd.f32 1.0, %v2691_v5  ;;  %v1761_v41 = vmul.f32 %v1745_v13, %v4032_v10  ;;  %v1851_v0 = vmul.f32 %v4114_v26, %v4114_v26 }
 0x4c0   :  { %v2693_v38 = vpop.eup %2692  ;;  %v1860_v62 = vadd.f32 %v1859_v23, %v1849_v7  ;;  %v1817_v10 = vadd.f32 %v1816_v59, %v4114_v26  ;;  %v1873_v63 = vadd.f32 %v1872_v57, %v1850_v54 }
 0x4c1   :  { %v1747_v55 = vadd.f32 1.0, %v2693_v38  ;;  %v1852_v49 = vmul.f32 %v4120_v15, %v4120_v15  ;;  %v1762_v44 = vmul.f32 %v1746_v58, %v4037_v39  ;;  %v4133_v18 = vmul.f32 %v1791_v45, %v1761_v41  ;;  %2198 = vperm.xlu1 %2554, %v3989_v2  }
 0x4c2   :  { %v2695_v22 = vpop.eup %2694  ;;  %v1830_v27 = vadd.f32 %v1829_v11, %v4120_v15  ;;  %v1861_v39 = vadd.f32 %v1860_v62, %v1851_v0 }
 0x4c3   :  { %v1748_v40 = vadd.f32 1.0, %v2695_v22  ;;  %v1763_v17 = vmul.f32 %v1747_v55, %v4050_v9  ;;  %v4139_v5 = vmul.f32 %v1791_v45, %v1762_v44  ;;  %v1853_v61 = vmul.f32 %v4133_v18, %v4133_v18 }
 0x4c4   :  { %v1818_v13 = vadd.f32 %v1817_v10, %v4133_v18  ;;  %v1874_v7 = vadd.f32 %v1873_v63, %v1852_v49 }
 0x4c5   :  { %v1764_v8 = vmul.f32 %v1748_v40, %v4061_v31  ;;  %v1811_v32 = vmul.f32 %v1795_v16, %v1763_v17  ;;  %v1831_v9 = vadd.f32 %v1830_v27, %v4139_v5  ;;  %v1854_v50 = vmul.f32 %v4139_v5, %v4139_v5  ;;  %2206 = vperm.xlu1 %2554, %v4028_v19  }
 0x4c6   :  { %v1862_v38 = vadd.f32 %v1861_v39, %v1853_v61 }
 0x4c7   :  { %v1812_v23 = vmul.f32 %v1795_v16, %v1764_v8  ;;  %v1819_v54 = vadd.f32 %v1818_v13, %v1811_v32  ;;  %v1855_v58 = vmul.f32 %v1811_v32, %v1811_v32  ;;  %v1875_v41 = vadd.f32 %v1874_v7, %v1854_v50 }
 0x4c9   :  { %v1820_v57 = vrot.slane %v1819_v54, 4  ;;  %v1832_v59 = vadd.f32 %v1831_v9, %v1812_v23  ;;  %v1856_v0 = vmul.f32 %v1812_v23, %v1812_v23  ;;  %v1863_v45 = vadd.f32 %v1862_v38, %v1855_v58  ;;  %2214 = vperm.xlu1 %2554, %v4045_v51  }
 0x4cb   :  { %v1821_v55 = vadd.f32 %v1820_v57, %v1819_v54  ;;  %v1833_v31 = vrot.slane %v1832_v59, 4  ;;  %v1864_v22 = vrot.slane %v1863_v45, 4  ;;  %v1876_v11 = vadd.f32 %v1875_v41, %v1856_v0 }
 0x4cd   :  { %v1822_v49 = vrot.slane %v1821_v55, 2  ;;  %v1834_v44 = vadd.f32 %v1833_v31, %v1832_v59  ;;  %v1865_v62 = vadd.f32 %v1864_v22, %v1863_v45  ;;  %v1877_v10 = vrot.slane %v1876_v11, 4 }
 0x4cf   :  { %v1823_v40 = vadd.f32 %v1822_v49, %v1821_v55  ;;  %v1835_v17 = vrot.slane %v1834_v44, 2  ;;  %v1866_v63 = vrot.slane %v1865_v62, 2  ;;  %v1878_v27 = vadd.f32 %v1877_v10, %v1876_v11 }
 0x4d1   :  { %v1824_v2 = vrot.slane %v1823_v40, 1  ;;  %v1836_v61 = vadd.f32 %v1835_v17, %v1834_v44  ;;  %v1867_v16 = vadd.f32 %v1866_v63, %v1865_v62  ;;  %v1879_v39 = vrot.slane %v1878_v27, 2 }
 0x4d3   :  { %v1825_v13 = vadd.f32 %v1824_v2, %v1823_v40  ;;  %v1837_v8 = vrot.slane %v1836_v61, 1  ;;  %v1868_v7 = vrot.slane %v1867_v16, 1  ;;  %v1880_v9 = vadd.f32 %v1879_v39, %v1878_v27 }
 0x4d5   :  { %v1838_v50 = vadd.f32 %v1837_v8, %v1836_v61  ;;  %v4151_v19 = vmul.f32 0.015625, %v1825_v13  ;;  %v1869_v38 = vadd.f32 %v1868_v7, %v1867_v16  ;;  %v1881_v54 = vrot.slane %v1880_v9, 1 }
 0x4d7   :  { %v4153_v58 = vmul.f32 0.015625, %v1838_v50  ;;  %v1882_v41 = vadd.f32 %v1881_v54, %v1880_v9  ;;  %v1883_v57 = vmul.f32 0.015625, %v1869_v38  ;;  %v1885_v51 = vmul.f32 %v4151_v19, %v4151_v19 }
 0x4d8   :  { %v1905_v40 = vsub.f32 %v1811_v32, %v4151_v19  ;;  %v1903_v2 = vsub.f32 %v4133_v18, %v4151_v19  ;;  %v1901_v32 = vsub.f32 %v4114_v26, %v4151_v19  ;;  %v1899_v13 = vsub.f32 %v4102_v52, %v4151_v19 }
 0x4d9   :  { %v1884_v59 = vmul.f32 0.015625, %v1882_v41  ;;  %v1886_v0 = vmul.f32 %v4153_v58, %v4153_v58  ;;  %v1887_v45 = vsub.f32 %v1883_v57, %v1885_v51  ;;  %v1906_v62 = vsub.f32 %v1812_v23, %v4153_v58 }
 0x4da   :  { %v1904_v63 = vsub.f32 %v4139_v5, %v4153_v58  ;;  %v1902_v16 = vsub.f32 %v4120_v15, %v4153_v58  ;;  %v1900_v5 = vsub.f32 %v4108_v29, %v4153_v58  ;;  %v1898_v8 = vsub.f32 %v4089_v33, %v4153_v58 }
 0x4db   :  { %v1888_v55 = vsub.f32 %v1884_v59, %v1886_v0  ;;  %v1889_v31 = vmax.f32 %v1887_v45, 0.0  ;;  %v1897_v7 = vsub.f32 %v4084_v46, %v4151_v19  ;;  %v1896_v9 = vsub.f32 %v4075_v37, %v4153_v58  ;;  %v2415_v59 = vld [vmem:[%s4315_s2 + $0xd8] sm:$0xff]  ;;  %v2416_v0 = vld [vmem:[%s4315_s2 + $0xe0] sm:$0xff]  ;;  %v2417_v45 = vld [vmem:[%s4315_s2 + $0xe8] sm:$0xff] }
 0x4dc   :  { %v1895_v50 = vsub.f32 %v4073_v47, %v4151_v19  ;;  %v1894_v38 = vsub.f32 %v4065_v56, %v4153_v58  ;;  %v1893_v54 = vsub.f32 %v4058_v21, %v4151_v19  ;;  %v1892_v41 = vsub.f32 %v4067_v12, %v4153_v58  ;;  %v2412_v21 = vld [vmem:[%s4315_s2 + $0xc0] sm:$0xff]  ;;  %v2418_v12 = vld [vmem:[%s4315_s2 + $0xf0] sm:$0xff] }
 0x4dd   :  { %v1890_v22 = vmax.f32 %v1888_v55, 0.0  ;;  %v1907_v11 = vadd.f32 1e-05, %v1889_v31  ;;  %v1891_v57 = vsub.f32 %v4063_v24, %v4151_v19  ;;  %v2413_v24 = vld [vmem:[%s4315_s2 + $0xc8] sm:$0xff]  ;;  %v2419_v19 = vld [vmem:[%s4315_s2 + $0xf8] sm:$0xff]  ;;  %v2414_v58 = vld [vmem:[%s4315_s2 + $0xd0] sm:$0xff]  ;;  %v1938_v55 = vpop.permute.xlu1 %1937 }
 0x4df   :  { %v1908_v49 = vadd.f32 1e-05, %v1890_v22  ;;  %2696 = vrsqrt.f32 %v1907_v11 }
 0x4e1   :  { %2698 = vrsqrt.f32 %v1908_v49  ;;  %v1946_v31 = vpop.permute.xlu1 %1945  ;;  %v1942_v49 = vpop.permute.xlu0 %1941 }
 0x4e5   :  { %v1950_v22 = vpop.permute.xlu1 %1949 }
 0x4e9   :  { %v2127_v11 = vpop.permute.xlu1 %2126 }
 0x4ec   :  { %v2697_v44 = vpop.eup %2696 }
 0x4ed   :  { %v1925_v27 = vmul.f32 %v2697_v44, %v1905_v40  ;;  %v1923_v23 = vmul.f32 %v2697_v44, %v1903_v2  ;;  %v1921_v18 = vmul.f32 %v2697_v44, %v1901_v32  ;;  %v1919_v26 = vmul.f32 %v2697_v44, %v1899_v13 }
 0x4ee   :  { %v2699_v10 = vpop.eup %2698  ;;  %v1917_v52 = vmul.f32 %v2697_v44, %v1897_v7  ;;  %v1915_v46 = vmul.f32 %v2697_v44, %v1895_v50  ;;  %v1913_v47 = vmul.f32 %v2697_v44, %v1893_v54  ;;  %v1911_v51 = vmul.f32 %v2697_v44, %v1891_v57 }
 0x4ef   :  { %v1926_v17 = vmul.f32 %v2699_v10, %v1906_v62  ;;  %v1924_v61 = vmul.f32 %v2699_v10, %v1904_v63  ;;  %v1922_v39 = vmul.f32 %v2699_v10, %v1902_v16  ;;  %v1920_v15 = vmul.f32 %v2699_v10, %v1900_v5  ;;  %v2123_v62 = vpop.permute.xlu0 %2122 }
 0x4f0   :  { %v1918_v29 = vmul.f32 %v2699_v10, %v1898_v8  ;;  %v1916_v33 = vmul.f32 %v2699_v10, %v1896_v9  ;;  %v1914_v37 = vmul.f32 %v2699_v10, %v1894_v38  ;;  %v1912_v56 = vmul.f32 %v2699_v10, %v1892_v41 }
 0x4f1   :  { %2008 = vmatprep.subr.mxu0 %v1926_v17  ;;  %2476 = vmatprep.subr.mxu1 %v1926_v17 }
 0x4f2   :  { %2009 = vmatpush1.msra.mxu0 %v1925_v27  ;;  %2484 = vmatpush1.msra.mxu1 %v1925_v27 }
 0x4f3   :  { %2010 = vmatprep.subr.mxu0 %v1924_v61  ;;  %2477 = vmatprep.subr.mxu1 %v1924_v61  ;;  %v2131_v40 = vpop.permute.xlu0 %2130 }
 0x4f4   :  { %2011 = vmatpush1.msra.mxu0 %v1923_v23  ;;  %2485 = vmatpush1.msra.mxu1 %v1923_v23 }
 0x4f5   :  { %2012 = vmatprep.subr.mxu0 %v1922_v39  ;;  %2478 = vmatprep.subr.mxu1 %v1922_v39 }
 0x4f6   :  { %2013 = vmatpush1.msra.mxu0 %v1921_v18  ;;  %2486 = vmatpush1.msra.mxu1 %v1921_v18 }
 0x4f7   :  { %2014 = vmatprep.subr.mxu0 %v1920_v15  ;;  %2479 = vmatprep.subr.mxu1 %v1920_v15  ;;  %v2135_v16 = vpop.permute.xlu0 %2134 }
 0x4f8   :  { %2015 = vmatpush1.msra.mxu0 %v1919_v26  ;;  %2487 = vmatpush1.msra.mxu1 %v1919_v26 }
 0x4f9   :  { %2016 = vmatprep.subr.mxu0 %v1918_v29  ;;  %2480 = vmatprep.subr.mxu1 %v1918_v29 }
 0x4fa   :  { %2017 = vmatpush1.msra.mxu0 %v1917_v52  ;;  %2488 = vmatpush1.msra.mxu1 %v1917_v52 }
 0x4fb   :  { %2018 = vmatprep.subr.mxu0 %v1916_v33  ;;  %2481 = vmatprep.subr.mxu1 %v1916_v33 }
 0x4fc   :  { %2019 = vmatpush1.msra.mxu0 %v1915_v46  ;;  %2489 = vmatpush1.msra.mxu1 %v1915_v46 }
 0x4fd   :  { %2020 = vmatprep.subr.mxu0 %v1914_v37  ;;  %2482 = vmatprep.subr.mxu1 %v1914_v37 }
 0x4fe   :  { %2021 = vmatpush1.msra.mxu0 %v1913_v47  ;;  %2490 = vmatpush1.msra.mxu1 %v1913_v47 }
 0x4ff   :  { %2022 = vmatprep.subr.mxu0 %v1912_v56  ;;  %2483 = vmatprep.subr.mxu1 %v1912_v56 }
 0x500   :  { %2023 = vmatpush1.msra.mxu0 %v1911_v51  ;;  %2491 = vmatpush1.msra.mxu1 %v1911_v51 }
 0x501   :  { %2420 = vmatmul.mubr.msk.f32.vlgmr.msra.gmra.mxu0 %vm643_vm1, %v2412_v21  ;;  %2426 = vmatmul.mubr.msk.f32.vlgmr.msra.gmra.mxu1 %vm643_vm1, %v2418_v12 }
 0x502   :  { %2062 = vmatprep.mubr.f32.mxu0 %v4323_v34  ;;  %2098 = vmatprep.mubr.f32.mxu1 %v4323_v34 }
 0x505   :  { %2421 = vmatmul.mubr.msk.f32.gmra.mxu0 %vm643_vm1, %v2413_v24  ;;  %2427 = vmatmul.mubr.msk.f32.gmra.mxu1 %vm643_vm1, %v2419_v19 }
 0x506   :  { %2068 = vmatprep.mubr.f32.mxu0 %v4323_v34 }
 0x509   :  { %2422 = vmatmul.mubr.msk.f32.gmra.mxu0 %vm643_vm1, %v2414_v58 }
 0x50a   :  { %2074 = vmatprep.mubr.f32.mxu0 %v4323_v34 }
 0x50d   :  { %2423 = vmatmul.mubr.msk.f32.gmra.mxu0 %vm643_vm1, %v2415_v59 }
 0x50e   :  { %2080 = vmatprep.mubr.f32.mxu0 %v4323_v34 }
 0x511   :  { %2424 = vmatmul.mubr.msk.f32.gmra.mxu0 %vm643_vm1, %v2416_v0  ;;  %v4227_v44 = vpop.permute.xlu1 %1953  ;;  %v2139_v9 = vpop.permute.xlu0 %2138 }
 0x512   :  { %2086 = vmatprep.mubr.f32.mxu0 %v4323_v34 }
 0x515   :  { %2425 = vmatmul.mubr.msk.f32.gmra.mxu0 %vm643_vm1, %v2417_v45 }
 0x51d   :  { %v4229_v10 = vpop.permute.xlu1 %1957  ;;  %v2143_v19 = vpop.permute.xlu0 %2142 }
 0x526   :  { %v1962_v63 = vpop.permute.xlu1 %1961 }
 0x52a   :  { %v1966_v18 = vpop.permute.xlu1 %1965 }
 0x5c1   :  { %v2058_v17 = vpop.f32.mrf.mxu0  ;;  %v2094_v2 = vpop.f32.mrf.mxu1 }
 0x5c2   :  { %v2059_v34 = vadd.f32 %v2058_v17, %v1938_v55  ;;  %v2095_v54 = vadd.f32 %v2094_v2, %v1962_v63 }
 0x5c3   :  { %v2060_v27 = vpop.f32.mrf.mxu0  ;;  %v2096_v15 = vpop.f32.mrf.mxu1 }
 0x5c4   :  { %v2061_v61 = vadd.f32 %v2060_v27, %v1938_v55  ;;  %v2105_v32 = vadd.f32 %v2059_v34, %v3643_v53  ;;  %v2117_v58 = vadd.f32 %v2095_v54, %v3733_v20  ;;  %v2097_v59 = vadd.f32 %v2096_v15, %v1962_v63  ;;  %v2151_v27 = vpop.permute.xlu0 %2150 }
 0x5c5   :  { %v2064_v23 = vpop.f32.mrf.mxu0  ;;  %v2100_v53 = vpop.f32.mrf.mxu1 }
 0x5c6   :  { %v2065_v39 = vadd.f32 %v2064_v23, %v1942_v49  ;;  %v2106_v13 = vadd.f32 %v2061_v61, %v3646_v25  ;;  %v4234_v7 = vmul.f32 %v2123_v62, %v2105_v32 }
 0x5c7   :  { %v2066_v5 = vpop.f32.mrf.mxu0  ;;  %v2102_v12 = vpop.f32.mrf.mxu1 }
 0x5c8   :  { %v2107_v8 = vadd.f32 %v2065_v39, %v3649_v48  ;;  %v2067_v29 = vadd.f32 %v2066_v5, %v1942_v49  ;;  %v4238_v38 = vmul.f32 %v2123_v62, %v2106_v13  ;;  %v2147_v48 = vpop.permute.xlu1 %2146  ;;  %2700 = vtanh.f32 %v4234_v7 }
 0x5c9   :  { %v2070_v26 = vpop.f32.mrf.mxu0  ;;  %v4268_v63 = vmul.f32 %v2147_v48, %v2117_v58 }
 0x5ca   :  { %v4236_v52 = vmul.f32 %v2127_v11, %v2107_v8  ;;  %v2071_v50 = vadd.f32 %v2070_v26, %v1946_v31  ;;  %v2108_v46 = vadd.f32 %v2067_v29, %v3655_v36  ;;  %v2101_v36 = vadd.f32 %v2100_v53, %v1966_v18  ;;  %v2191_v8 = vpop.permute.xlu0 %2190 }
 0x5cb   :  { %v2072_v33 = vpop.f32.mrf.mxu0 }
 0x5cc   :  { %v2109_v25 = vadd.f32 %v2071_v50, %v3666_v4  ;;  %v2073_v37 = vadd.f32 %v2072_v33, %v1946_v31  ;;  %v4243_v47 = vmul.f32 %v2127_v11, %v2108_v46  ;;  %2702 = vtanh.f32 %v4236_v52 }
 0x5cd   :  { %v2076_v41 = vpop.f32.mrf.mxu0  ;;  %2704 = vtanh.f32 %v4238_v38  ;;  %v2103_v11 = vadd.f32 %v2102_v12, %v1966_v18  ;;  %v2119_v20 = vadd.f32 %v2101_v36, %v3755_v35 }
 0x5ce   :  { %v2077_v57 = vadd.f32 %v2076_v41, %v1950_v22  ;;  %v4246_v56 = vmul.f32 %v2131_v40, %v2109_v25  ;;  %v2110_v51 = vadd.f32 %v2073_v37, %v3676_v3  ;;  %v2220_v36 = vmul.f32 %v2191_v8, %v4243_v47 }
 0x5cf   :  { %v2078_v21 = vpop.f32.mrf.mxu0  ;;  %v2120_v2 = vadd.f32 %v2103_v11, %v3775_v1  ;;  %v4274_v23 = vmul.f32 %v2151_v27, %v2119_v20 }
 0x5d0   :  { %v2111_v4 = vadd.f32 %v2077_v57, %v3681_v14  ;;  %v2079_v24 = vadd.f32 %v2078_v21, %v1950_v22  ;;  %2706 = vtanh.f32 %v4246_v56  ;;  %v4253_v0 = vmul.f32 %v2131_v40, %v2110_v51  ;;  %v2187_v22 = vpop.permute.xlu1 %2186  ;;  %v2203_v51 = vpop.permute.xlu0 %2202 }
 0x5d1   :  { %v2082_v45 = vpop.f32.mrf.mxu0  ;;  %2708 = vtanh.f32 %v4243_v47  ;;  %v4283_v5 = vmul.f32 %v2151_v27, %v2120_v2  ;;  %v2217_v37 = vmul.f32 %v2187_v22, %v4234_v7 }
 0x5d2   :  { %v4256_v3 = vmul.f32 %v2135_v16, %v2111_v4  ;;  %v2112_v55 = vadd.f32 %v2079_v24, %v3694_v28  ;;  %v2083_v31 = vadd.f32 %v2082_v45, %v4227_v44  ;;  %2710 = vtanh.f32 %v4253_v0 }
 0x5d3   :  { %v2084_v14 = vpop.f32.mrf.mxu0  ;;  %v2118_v28 = vadd.f32 %v2097_v59, %v3744_v30 }
 0x5d4   :  { %2712 = vtanh.f32 %v4256_v3  ;;  %v4263_v49 = vmul.f32 %v2135_v16, %v2112_v55  ;;  %v2113_v62 = vadd.f32 %v2083_v31, %v3701_v60  ;;  %v2085_v40 = vadd.f32 %v2084_v14, %v4227_v44  ;;  %v2195_v44 = vpop.permute.xlu1 %2194  ;;  %v2211_v2 = vpop.permute.xlu0 %2210 }
 0x5d5   :  { %v2088_v17 = vpop.f32.mrf.mxu0  ;;  %v4279_v32 = vmul.f32 %v2147_v48, %v2118_v28  ;;  %v2701_v1 = vpop.eup %2700  ;;  %v2221_v48 = vmul.f32 %v2195_v44, %v4246_v56  ;;  %v2222_v7 = vmul.f32 %v2195_v44, %v4253_v0 }
 0x5d6   :  { %2714 = vtanh.f32 %v4263_v49  ;;  %v2161_v34 = vmul.f32 %v2139_v9, %v2113_v62  ;;  %v2114_v35 = vadd.f32 %v2085_v40, %v3710_v6  ;;  %v2089_v61 = vadd.f32 %v2088_v17, %v4229_v10 }
 0x5d7   :  { %v2090_v16 = vpop.f32.mrf.mxu0  ;;  %v2233_v53 = vadd.f32 1.0, %v2701_v1 }
 0x5d8   :  { %2716 = vtanh.f32 %v2161_v34  ;;  %v4276_v60 = vmul.f32 %v2139_v9, %v2114_v35  ;;  %v2115_v30 = vadd.f32 %v2089_v61, %v3718_v43  ;;  %v2091_v39 = vadd.f32 %v2090_v16, %v4229_v10  ;;  %v2199_v50 = vpop.permute.xlu1 %2198 }
 0x5d9   :  { %2718 = vtanh.f32 %v4268_v63  ;;  %v2703_v18 = vpop.eup %2702  ;;  %v2249_v24 = vmul.f32 %v2233_v53, %v2217_v37  ;;  %v2225_v20 = vmul.f32 %v2203_v51, %v2161_v34  ;;  %v2224_v17 = vmul.f32 %v2199_v50, %v4263_v49 }
 0x5da   :  { %2720 = vtanh.f32 %v4276_v60  ;;  %v2163_v6 = vmul.f32 %v2143_v19, %v2115_v30  ;;  %v2116_v13 = vadd.f32 %v2091_v39, %v3729_v42  ;;  %v2705_v15 = vpop.eup %2704  ;;  %v2235_v29 = vadd.f32 1.0, %v2703_v18 }
 0x5db   :  { %2722 = vtanh.f32 %v4274_v23  ;;  %v2219_v42 = vmul.f32 %v2191_v8, %v4236_v52  ;;  %v2234_v21 = vadd.f32 1.0, %v2705_v15  ;;  %v2223_v52 = vmul.f32 %v2199_v50, %v4256_v3 }
 0x5dc   :  { %2724 = vtanh.f32 %v2163_v6  ;;  %v4289_v26 = vmul.f32 %v2143_v19, %v2116_v13  ;;  %v2218_v19 = vmul.f32 %v2187_v22, %v4238_v38  ;;  %v2207_v59 = vpop.permute.xlu1 %2206  ;;  %v2226_v0 = vmul.f32 %v2203_v51, %v4276_v60 }
 0x5dd   :  { %v2707_v43 = vpop.eup %2706  ;;  %2726 = vtanh.f32 %v4279_v32  ;;  %v2251_v41 = vmul.f32 %v2235_v29, %v2219_v42  ;;  %v2227_v39 = vmul.f32 %v2207_v59, %v2163_v6 }
 0x5de   :  { %v2709_v10 = vpop.eup %2708  ;;  %2728 = vtanh.f32 %v4283_v5  ;;  %v2237_v46 = vadd.f32 1.0, %v2707_v43  ;;  %v2250_v47 = vmul.f32 %v2234_v21, %v2218_v19  ;;  %v2229_v43 = vmul.f32 %v2211_v2, %v4268_v63 }
 0x5df   :  { %v2711_v9 = vpop.eup %2710  ;;  %2730 = vtanh.f32 %v4289_v26  ;;  %v2236_v54 = vadd.f32 1.0, %v2709_v10  ;;  %v2265_v11 = vadd.f32 %v2251_v41, %v2249_v24 }
 0x5e0   :  { %v2238_v12 = vadd.f32 1.0, %v2711_v9  ;;  %v2253_v58 = vmul.f32 %v2237_v46, %v2221_v48  ;;  %v2215_v18 = vpop.permute.xlu1 %2214  ;;  %v2230_v46 = vmul.f32 %v2211_v2, %v4279_v32 }
 0x5e1   :  { %v2713_v33 = vpop.eup %2712  ;;  %v2252_v45 = vmul.f32 %v2236_v54, %v2220_v36  ;;  %v2231_v42 = vmul.f32 %v2215_v18, %v4274_v23 }
 0x5e2   :  { %v2239_v57 = vadd.f32 1.0, %v2713_v33  ;;  %v2254_v40 = vmul.f32 %v2238_v12, %v2222_v7  ;;  %v2266_v38 = vadd.f32 %v2265_v11, %v2253_v58  ;;  %v2228_v33 = vmul.f32 %v2207_v59, %v4289_v26 }
 0x5e3   :  { %v2715_v25 = vpop.eup %2714  ;;  %v2278_v35 = vadd.f32 %v2252_v45, %v2250_v47  ;;  %v2786_v59 = vmov 1966171168   ;;  %v2301_v7 = vlaneseq }
 0x5e4   :  { %v2240_v55 = vadd.f32 1.0, %v2715_v25  ;;  %v2255_v14 = vmul.f32 %v2239_v57, %v2223_v52  ;;  %v2232_v57 = vmul.f32 %v2215_v18, %v4283_v5  ;;  %v2299_v45 = vunpack.c.l.s4 %v2786_v59 }
 0x5e5   :  { %v2717_v4 = vpop.eup %2716  ;;  %v2279_v13 = vadd.f32 %v2278_v35, %v2254_v40  ;;  %vm2315_vm2 = vcmp.lt.s32.totalorder %v2301_v7, 256 }
 0x5e6   :  { %v2241_v31 = vadd.f32 1.0, %v2717_v4  ;;  %v2719_v56 = vpop.eup %2718  ;;  %v2256_v61 = vmul.f32 %v2240_v55, %v2224_v17  ;;  %v2267_v44 = vadd.f32 %v2266_v38, %v2255_v14  ;;  %v2300_v5 = vunpack.c.0.s8 %v2299_v45 }
 0x5e7   :  { %v2721_v62 = vpop.eup %2720  ;;  %v2245_v30 = vadd.f32 1.0, %v2719_v56  ;;  %v2302_v14 = vshrl.u32 %v2301_v7, 7 }
 0x5e8   :  { %v2723_v28 = vpop.eup %2722  ;;  %v2257_v22 = vmul.f32 %v2241_v31, %v2225_v20  ;;  %v2242_v27 = vadd.f32 1.0, %v2721_v62  ;;  %v2280_v50 = vadd.f32 %v2279_v13, %v2256_v61  ;;  %v2292_v20 = vstv %s4317_s4 }
 0x5e9   :  { %v2725_v3 = vpop.eup %2724  ;;  %v2247_v8 = vadd.f32 1.0, %v2723_v28  ;;  %v2261_v53 = vmul.f32 %v2245_v30, %v2229_v43  ;;  %v2303_v17 = vsub.s32 %v2300_v5, %v2302_v14 }
 0x5ea   :  { %v2727_v16 = vpop.eup %2726  ;;  %v2243_v34 = vadd.f32 1.0, %v2725_v3  ;;  %v2258_v15 = vmul.f32 %v2242_v27, %v2226_v0  ;;  %v2268_v10 = vadd.f32 %v2267_v44, %v2257_v22 }
 0x5eb   :  { %v2729_v1 = vpop.eup %2728  ;;  %v2246_v9 = vadd.f32 1.0, %v2727_v16  ;;  %v2263_v41 = vmul.f32 %v2247_v8, %v2231_v42 }
 0x5ec   :  { %v2731_v49 = vpop.eup %2730  ;;  %v2259_v29 = vmul.f32 %v2243_v34, %v2227_v39  ;;  %v2248_v54 = vadd.f32 1.0, %v2729_v1  ;;  %v2281_v25 = vadd.f32 %v2280_v50, %v2258_v15 }
 0x5ed   :  { %v2244_v60 = vadd.f32 1.0, %v2731_v49  ;;  %v2262_v63 = vmul.f32 %v2246_v9, %v2230_v46 }
 0x5ee   :  { %v2269_v6 = vadd.f32 %v2268_v10, %v2259_v29  ;;  %v2264_v36 = vmul.f32 %v2248_v54, %v2232_v57 }
 0x5ef   :  { %v2260_v37 = vmul.f32 %v2244_v60, %v2228_v33 }
 0x5f0   :  { %v2270_v48 = vadd.f32 %v2269_v6, %v2261_v53 }
 0x5f1   :  { %v2282_v51 = vadd.f32 %v2281_v25, %v2260_v37 }
 0x5f2   :  { %v2271_v21 = vadd.f32 %v2270_v48, %v2263_v41 }
 0x5f3   :  { %v2283_v12 = vadd.f32 %v2282_v51, %v2262_v63 }
 0x5f4   :  { %v2272_v26 = vrot.slane %v2271_v21, 4 }
 0x5f5   :  { %v2284_v4 = vadd.f32 %v2283_v12, %v2264_v36 }
 0x5f6   :  { %v2273_v24 = vadd.f32 %v2272_v26, %v2271_v21 }
 0x5f7   :  { %v2285_v19 = vrot.slane %v2284_v4, 4 }
 0x5f8   :  { %v2274_v23 = vrot.slane %v2273_v24, 2 }
 0x5f9   :  { %v2286_v58 = vadd.f32 %v2285_v19, %v2284_v4 }
 0x5fa   :  { %v2275_v52 = vadd.f32 %v2274_v23, %v2273_v24 }
 0x5fb   :  { %v2287_v32 = vrot.slane %v2286_v58, 2 }
 0x5fc   :  { %v2276_v55 = vrot.slane %v2275_v52, 1 }
 0x5fd   :  { %v2288_v31 = vadd.f32 %v2287_v32, %v2286_v58 }
 0x5fe   :  { %v2277_v56 = vadd.f32 %v2276_v55, %v2275_v52 }
 0x5ff   :  { %v2289_v11 = vrot.slane %v2288_v31, 1 }
 0x600   :  { %v2293_v47 = vadd.f32 %v2292_v20, %v2277_v56 }
 0x601   :  { %v2290_v62 = vadd.f32 %v2289_v11, %v2288_v31 }
 0x603   :  { %v2294_v40 = vadd.f32 %v2292_v20, %v2290_v62 }
 0x605   :  { %v2297_v28 = vcombine.low %v2293_v47, %v2294_v40 }
 0x607   :  { %v2304_v38 = vrot.slane %v2297_v28, %v2303_v17 }
 0x609   :  { %v2311_v22 = vrot.slane %v2304_v38, %v2303_v17 }
 0x60b   :  { %2317 = vst.msk [vmem:[#allocation3] sm:$0x3] %vm2315_vm2, %v2311_v22 }
 0x60c   :  { %2759 = shalt.err (!%p2756_p4)
}
 0x60d   :  { %2327 = dma.vmem_to_hbm [thread:$0]  %s2325_s28, 32, %s4318_s5, [#allocation4]  }
 0x60e   :  { %2768 = dma.done.wait [#allocation4], 32  }
 0x60f   :  { %2769 = vsyncadd [#allocation4], 4294967264 }
 0x610   :  { %2331 = vsyncpa [#allocation4], 1 }

</bundles_post_ra>
